<compile_context>
chip_gen: v5e
topology: v5e:2x2
jax: 0.10.0
libtpu: 0.0.40
codegen_flags: <defaults>
</compile_context>

<pallas_src>
import functools

import jax
import jax.numpy as jnp
from jax import lax
from jax.experimental import pallas as pl
from jax.experimental.pallas import tpu as pltpu


def _bert_embedding_kernel(
    # scalar-prefetch refs (SMEM)
    tok_ids_ref,            # (n_pad,) int32 — flat token ids (drive the row-gather DMAs)
    seed_ref,               # (1,)    int32 — dropout seed
    # inputs
    merged_hbm,             # (V, 2*Ep) in HBM (pl.ANY): [token table | position table]
    seg_tbl_ref,            # (G, Ep)  VMEM block — whole segment table
    seg_ids_ref,            # (tt, 1)  VMEM block — this tile's segment ids
    # output
    out_ref,                # (tt, Ep) VMEM block
    # scratch
    buf,                    # (2, tt, 2*Ep) VMEM — double-buffered gathered rows
    sems,                   # (2,) DMA semaphores — one aggregate sem per slot
    *, nt_inner: int, dropout_rate: float, training: bool,
):
    o = pl.program_id(0)            # outer "parallel" chunk
    t = pl.program_id(1)            # inner "arbitrary" tile within the chunk
    tt = buf.shape[1]
    ep = buf.shape[2] // 2
    slot = t % 2

    def issue_tile(tile_idx, dst_slot):
        """Start one (1, 2*Ep) row DMA per token of `tile_idx` into buf[dst_slot]."""
        base = tile_idx * tt

        def body(r, carry):
            row = tok_ids_ref[base + r]
            pltpu.make_async_copy(
                merged_hbm.at[pl.ds(row, 1)],        # (1, 2*Ep) row in HBM
                buf.at[dst_slot, pl.ds(r, 1)],       # (1, 2*Ep) row in VMEM
                sems.at[dst_slot],                   # shared per-slot semaphore
            ).start()
            return carry

        lax.fori_loop(0, tt, body, 0, unroll=8)

    # Prime the pipeline at the start of this core's sequential chunk.
    @pl.when(t == 0)
    def _():
        issue_tile(o * nt_inner, 0)

    # Prefetch the NEXT tile's rows before waiting on the current one, so the
    # gather overlaps this tile's compute + writeback.
    @pl.when(t + 1 < nt_inner)
    def _():
        issue_tile(o * nt_inner + t + 1, 1 - slot)

    # Aggregate wait: all tt row copies for `slot` signalled the same semaphore;
    # one wait for the full buffer's byte count drains it.
    pltpu.make_async_copy(buf.at[slot], buf.at[slot], sems.at[slot]).wait()

    rows = buf[slot].astype(jnp.float32)             # (tt, 2*Ep), f32 accumulate
    emb = rows[:, :ep] + rows[:, ep:]                # token + position (same row index)

    # Segment embedding: G == 3, table is VMEM-resident -> 3 VPU selects
    # replace tt per-token DMAs.
    sid = seg_ids_ref[...]                           # (tt, 1) int32
    seg_tbl = seg_tbl_ref[...].astype(jnp.float32)   # (G, Ep)
    for g in range(seg_tbl_ref.shape[0]):            # static, tiny
        emb = emb + jnp.where(sid == g, 1.0, 0.0) * seg_tbl[g][None, :]

    if training and dropout_rate > 0.0:
        # Inverted dropout with a stateless hash keyed on the ABSOLUTE flat
        # token index and feature index -> mask is independent of tiling.
        base = (o * nt_inner + t) * tt
        n_idx = base + lax.broadcasted_iota(jnp.int32, emb.shape, 0)
        f_idx = lax.broadcasted_iota(jnp.int32, emb.shape, 1)
        h = (seed_ref[0].astype(jnp.uint32)
             + n_idx.astype(jnp.uint32) * jnp.uint32(0x9E3779B1)
             + f_idx.astype(jnp.uint32) * jnp.uint32(0x85EBCA77))
        h = h ^ (h >> 16)
        h = h * jnp.uint32(0x7FEB352D)
        h = h ^ (h >> 15)
        h = h * jnp.uint32(0x846CA68B)
        h = h ^ (h >> 16)
        u = (h >> 9).astype(jnp.float32) * jnp.float32(1.0 / (1 << 23))  # uniform [0,1)
        inv_keep = jnp.float32(1.0 / (1.0 - float(dropout_rate)))
        emb = emb * jnp.where(u >= jnp.float32(dropout_rate), inv_keep, jnp.float32(0.0))

    out_ref[...] = emb


def bert_embedding(tokens, segments, tok_table, pos_table, seg_table, *,
                   dropout_rate=0.1, training=False, dropout_seed=0,
                   tokens_per_tile=256):
    """Fused BertEmbedding forward.

    tokens   : (B, S) int  token ids
    segments : (B, S) int  segment labels in [0, seg_table.shape[0])
    tok_table: (V, E)      token embedding table (pad row zeroed by caller)
    pos_table: (V, E)      positional table (indexed by token ids, per source module)
    seg_table: (G, E)      segment embedding table (G == 3 in BERT)
    returns  : (B, S, E) f32
    """
    B, S = tokens.shape
    V, E = tok_table.shape
    assert pos_table.shape == (V, E), "position table must match (vocab, emb_dim)"
    G, e_seg = seg_table.shape
    assert e_seg == E

    tt = int(tokens_per_tile)
    assert tt % 8 == 0, "tokens_per_tile must be a multiple of 8"

    # Lane-dense feature dim: pad E up to a multiple of 128 so output stores are
    # unmasked and row DMAs lane-aligned.  Real BERT (E=768) needs no padding.
    ep = ((E + 127) // 128) * 128
    if ep != E:
        pad_e = ((0, 0), (0, ep - E))
        tok_t = jnp.pad(tok_table, pad_e)
        pos_t = jnp.pad(pos_table, pad_e)
        seg_t = jnp.pad(seg_table, pad_e)
    else:
        tok_t, pos_t, seg_t = tok_table, pos_table, seg_table

    # Merge token + position tables along E: one (1, 2*Ep) row DMA per token.
    # (For production, pre-merge once outside the step function.)
    merged = jnp.concatenate([tok_t, pos_t], axis=1)                 # (V, 2*ep)

    # Grid: outer "parallel" axis of 2 chunks (shards across the 2 TensorCores
    # on v7x; harmless on single-core v5e/v6e), inner "arbitrary" axis of tiles
    # processed sequentially so the cross-step double-buffer carry is legal.
    N = B * S
    n_tiles_req = -(-N // tt)
    outer = 2 if n_tiles_req > 1 else 1
    nt_inner = -(-n_tiles_req // outer)
    n_pad = outer * nt_inner * tt

    tok_flat = jnp.clip(tokens.reshape(N).astype(jnp.int32), 0, V - 1)
    seg_flat = jnp.clip(segments.reshape(N).astype(jnp.int32), 0, G - 1)
    if n_pad != N:
        # Padded tail tokens gather row 0 and are sliced off after the call.
        tok_flat = jnp.pad(tok_flat, (0, n_pad - N))
        seg_flat = jnp.pad(seg_flat, (0, n_pad - N))
    seg_ids2d = seg_flat.reshape(n_pad, 1)
    seed = jnp.asarray([dropout_seed], dtype=jnp.int32)

    kernel = functools.partial(
        _bert_embedding_kernel,
        nt_inner=nt_inner,
        dropout_rate=float(dropout_rate),
        training=bool(training),
    )

    out_flat = pl.pallas_call(
        kernel,
        out_shape=jax.ShapeDtypeStruct((n_pad, ep), jnp.float32),
        grid_spec=pltpu.PrefetchScalarGridSpec(
            num_scalar_prefetch=2,                        # token ids + dropout seed -> SMEM
            grid=(outer, nt_inner),
            in_specs=[
                pl.BlockSpec(memory_space=pl.ANY),        # merged tok|pos table stays in HBM
                pl.BlockSpec((G, ep), lambda o, t, *_: (0, 0)),                 # segment table (VMEM)
                pl.BlockSpec((tt, 1), lambda o, t, *_: (o * nt_inner + t, 0)),  # tile's segment ids
            ],
            out_specs=pl.BlockSpec((tt, ep), lambda o, t, *_: (o * nt_inner + t, 0)),
            scratch_shapes=[
                pltpu.VMEM((2, tt, 2 * ep), merged.dtype),  # double-buffered gathered rows
                pltpu.SemaphoreType.DMA((2,)),              # one aggregate DMA sem per slot
            ],
        ),
        compiler_params=pltpu.CompilerParams(
            dimension_semantics=("parallel", "arbitrary"),
            vmem_limit_bytes=32 * 1024 * 1024,
        ),
    )(tok_flat, seed, merged, seg_t, seg_ids2d)

    return out_flat[:N, :E].reshape(B, S, E)


if __name__ == "__main__":
    # Small, deterministic setup consistent with the module's __init__.
    vocab_size = 32
    emb_dim = 32            # == config.hidden_size (the three embeddings are summed)
    pad_idx = 0             # config.pad_idx
    dropout_rate = 0.1      # config.dropout
    batch, seq = 2, 16

    key = jax.random.PRNGKey(0)
    k_tw, k_sw, k_tok, k_seg = jax.random.split(key, 4)

    # TokenEmbedding: nn.Embedding init N(0, 1), padding_idx row zeroed.
    tok_table = jax.random.normal(k_tw, (vocab_size, emb_dim), dtype=jnp.float32)
    tok_table = tok_table.at[pad_idx].set(0.0)

    # PositionEmbedding: sinusoidal table (built at init), pad row zeroed.
    pos = jnp.arange(vocab_size, dtype=jnp.float32)[:, None]
    dim = jnp.arange(emb_dim)[None, :]
    angle = pos / jnp.power(10000.0, 2.0 * (dim // 2).astype(jnp.float32) / emb_dim)
    pos_table = jnp.where(dim % 2 == 0, jnp.sin(angle), jnp.cos(angle)).astype(jnp.float32)
    pos_table = pos_table.at[pad_idx].set(0.0)

    # SegmentEmbedding: 3 segments, N(0, 1) init.
    seg_table = jax.random.normal(k_sw, (3, emb_dim), dtype=jnp.float32)

    tokens = jax.random.randint(k_tok, (batch, seq), 0, vocab_size, dtype=jnp.int32)
    tokens = tokens.at[0, 0].set(pad_idx).at[1, 3].set(pad_idx)   # exercise padding_idx path
    segments = jax.random.randint(k_seg, (batch, seq), 0, 3, dtype=jnp.int32)

    ref = tok_table[tokens] + pos_table[tokens] + seg_table[segments]

    # --- eval mode (dropout off): exact check vs plain JAX gather, at two tile
    #     sizes to verify the result is independent of the tiling/grid. ---
    out = None
    for tt_ in (8, 16):
        out = bert_embedding(tokens, segments, tok_table, pos_table, seg_table,
                             dropout_rate=dropout_rate, training=False,
                             tokens_per_tile=tt_)
        out = jax.block_until_ready(out)
        assert out.shape == (batch, seq, emb_dim)
        assert jnp.allclose(out, ref, atol=1e-5), f"mismatch vs reference (tt={tt_})"
    # pad token: zero token row AND zero position row -> only the segment row remains
    assert jnp.allclose(out[0, 0], seg_table[segments[0, 0]], atol=1e-5), \
        "pad token must contribute zero token/position embeddings"

    # --- train mode: in-kernel hashed dropout; the mask is keyed on absolute
    #     token/feature indices so it is identical across tile sizes. ---
    outs_tr = []
    for tt_ in (8, 16):
        o_tr = bert_embedding(tokens, segments, tok_table, pos_table, seg_table,
                              dropout_rate=dropout_rate, training=True,
                              dropout_seed=123, tokens_per_tile=tt_)
        outs_tr.append(jax.block_until_ready(o_tr))
    assert outs_tr[0].shape == (batch, seq, emb_dim)
    assert bool(jnp.isfinite(outs_tr[0]).all())
    assert jnp.allclose(outs_tr[0], outs_tr[1]), "dropout mask must not depend on tiling"
    zero_frac = float((outs_tr[0] == 0.0).mean())
    assert 0.01 <= zero_frac <= 0.3, f"unexpected dropout zero fraction: {zero_frac}"
    kept = outs_tr[0] != 0.0
    assert jnp.allclose(jnp.where(kept, outs_tr[0] * (1.0 - dropout_rate), ref), ref,
                        atol=1e-4), "kept elements must equal ref / (1 - rate)"

    print("KERNEL_OK")
</pallas_src>

<mosaic_0001>
module attributes {stable_mosaic.version = 11 : i64} {
  func.func @_bert_embedding_kernel(%arg0: i32, %arg1: i32, %arg2: memref<32xi32, #tpu.memory_space<smem>>, %arg3: memref<1xi32, #tpu.memory_space<smem>>, %arg4: memref<32x256xf32, #tpu.memory_space<any>>, %arg5: memref<3x128xf32, #tpu.memory_space<vmem>>, %arg6: memref<8x1xi32, #tpu.memory_space<vmem>>, %arg7: memref<8x128xf32, #tpu.memory_space<vmem>>, %arg8: memref<2x8x256xf32, #tpu.memory_space<vmem>>, %arg9: memref<2x!tpu.dma_semaphore, #tpu.memory_space<semaphore_mem>>) attributes {dimension_semantics = [#tpu.dimension_semantics<parallel>, #tpu.dimension_semantics<arbitrary>], iteration_bounds = array<i64: 2, 2>, scalar_prefetch = 2 : i64, scratch_operands = 2 : i64, tpu.core_type = #tpu.core_type<tc>, window_params = [{}, {pipeline_mode = #tpu.pipeline_mode<synchronous>, transform_indices = @transform_1, window_bounds = array<i64: 3, 128>}, {transform_indices = @transform_2, window_bounds = array<i64: 8, 1>}, {transform_indices = @transform_3, window_bounds = array<i64: 8, 128>}]} {
    %c2_i32 = arith.constant 2 : i32
    %c0_i32 = arith.constant 0 : i32
    %0 = arith.cmpi eq, %c2_i32, %c0_i32 : i32
    %c1_i32 = arith.constant 1 : i32
    %1 = arith.select %0, %c1_i32, %c2_i32 : i32
    %2 = arith.remsi %arg1, %1 : i32
    %c0_i32_0 = arith.constant 0 : i32
    %3 = arith.cmpi ne, %2, %c0_i32_0 : i32
    %c0_i32_1 = arith.constant 0 : i32
    %4 = arith.cmpi slt, %2, %c0_i32_1 : i32
    %c0_i32_2 = arith.constant 0 : i32
    %5 = arith.cmpi slt, %1, %c0_i32_2 : i32
    %6 = arith.xori %4, %5 : i1
    %7 = arith.andi %6, %3 : i1
    %8 = arith.addi %2, %1 : i32
    %9 = arith.select %7, %8, %2 : i32
    %c0_i32_3 = arith.constant 0 : i32
    %10 = arith.cmpi eq, %arg1, %c0_i32_3 : i32
    %11 = arith.extui %10 : i1 to i32
    %c0_i32_4 = arith.constant 0 : i32
    %12 = arith.cmpi ne, %11, %c0_i32_4 : i32
    scf.if %12 {
      %c2_i32_27 = arith.constant 2 : i32
      %68 = arith.muli %arg0, %c2_i32_27 : i32
      %c8_i32 = arith.constant 8 : i32
      %69 = arith.muli %68, %c8_i32 : i32
      %c0_i32_28 = arith.constant 0 : i32
      %70 = arith.addi %69, %c0_i32_28 : i32
      %71 = arith.index_cast %70 : i32 to index
      %72 = memref.load %arg2[%71] : memref<32xi32, #tpu.memory_space<smem>>
      %c0_i32_29 = arith.constant 0 : i32
      %c0_i32_30 = arith.constant 0 : i32
      %c0_i32_31 = arith.constant 0 : i32
      %73 = tpu.memref_slice %arg4[%72, %c0_i32_31] : memref<32x256xf32, #tpu.memory_space<any>> -> memref<1x256xf32, #tpu.memory_space<any>>
      %c0_i32_32 = arith.constant 0 : i32
      %74 = tpu.memref_slice %arg8[%c0_i32_29, %c0_i32_28, %c0_i32_32] : memref<2x8x256xf32, #tpu.memory_space<vmem>> -> memref<1x1x256xf32, #tpu.memory_space<vmem>>
      %75 = tpu.memref_squeeze %74 : memref<1x1x256xf32, #tpu.memory_space<vmem>> -> memref<1x256xf32, #tpu.memory_space<vmem>>
      %76 = tpu.memref_slice %arg9[%c0_i32_30] : memref<2x!tpu.dma_semaphore, #tpu.memory_space<semaphore_mem>> -> memref<1x!tpu.dma_semaphore, #tpu.memory_space<semaphore_mem>>
      %77 = tpu.memref_squeeze %76 : memref<1x!tpu.dma_semaphore, #tpu.memory_space<semaphore_mem>> -> memref<!tpu.dma_semaphore, #tpu.memory_space<semaphore_mem>>
      tpu.enqueue_dma source(%73 : memref<1x256xf32, #tpu.memory_space<any>>) target(%75 : memref<1x256xf32, #tpu.memory_space<vmem>>) target_semaphore(%77 : memref<!tpu.dma_semaphore, #tpu.memory_space<semaphore_mem>>)
      %c1_i32_33 = arith.constant 1 : i32
      %78 = arith.addi %69, %c1_i32_33 : i32
      %79 = arith.index_cast %78 : i32 to index
      %80 = memref.load %arg2[%79] : memref<32xi32, #tpu.memory_space<smem>>
      %c0_i32_34 = arith.constant 0 : i32
      %c0_i32_35 = arith.constant 0 : i32
      %c0_i32_36 = arith.constant 0 : i32
      %81 = tpu.memref_slice %arg4[%80, %c0_i32_36] : memref<32x256xf32, #tpu.memory_space<any>> -> memref<1x256xf32, #tpu.memory_space<any>>
      %c0_i32_37 = arith.constant 0 : i32
      %82 = tpu.memref_slice %arg8[%c0_i32_34, %c1_i32_33, %c0_i32_37] : memref<2x8x256xf32, #tpu.memory_space<vmem>> -> memref<1x1x256xf32, #tpu.memory_space<vmem>>
      %83 = tpu.memref_squeeze %82 : memref<1x1x256xf32, #tpu.memory_space<vmem>> -> memref<1x256xf32, #tpu.memory_space<vmem>>
      %84 = tpu.memref_slice %arg9[%c0_i32_35] : memref<2x!tpu.dma_semaphore, #tpu.memory_space<semaphore_mem>> -> memref<1x!tpu.dma_semaphore, #tpu.memory_space<semaphore_mem>>
      %85 = tpu.memref_squeeze %84 : memref<1x!tpu.dma_semaphore, #tpu.memory_space<semaphore_mem>> -> memref<!tpu.dma_semaphore, #tpu.memory_space<semaphore_mem>>
      tpu.enqueue_dma source(%81 : memref<1x256xf32, #tpu.memory_space<any>>) target(%83 : memref<1x256xf32, #tpu.memory_space<vmem>>) target_semaphore(%85 : memref<!tpu.dma_semaphore, #tpu.memory_space<semaphore_mem>>)
      %c2_i32_38 = arith.constant 2 : i32
      %86 = arith.addi %69, %c2_i32_38 : i32
      %87 = arith.index_cast %86 : i32 to index
      %88 = memref.load %arg2[%87] : memref<32xi32, #tpu.memory_space<smem>>
      %c0_i32_39 = arith.constant 0 : i32
      %c0_i32_40 = arith.constant 0 : i32
      %c0_i32_41 = arith.constant 0 : i32
      %89 = tpu.memref_slice %arg4[%88, %c0_i32_41] : memref<32x256xf32, #tpu.memory_space<any>> -> memref<1x256xf32, #tpu.memory_space<any>>
      %c0_i32_42 = arith.constant 0 : i32
      %90 = tpu.memref_slice %arg8[%c0_i32_39, %c2_i32_38, %c0_i32_42] : memref<2x8x256xf32, #tpu.memory_space<vmem>> -> memref<1x1x256xf32, #tpu.memory_space<vmem>>
      %91 = tpu.memref_squeeze %90 : memref<1x1x256xf32, #tpu.memory_space<vmem>> -> memref<1x256xf32, #tpu.memory_space<vmem>>
      %92 = tpu.memref_slice %arg9[%c0_i32_40] : memref<2x!tpu.dma_semaphore, #tpu.memory_space<semaphore_mem>> -> memref<1x!tpu.dma_semaphore, #tpu.memory_space<semaphore_mem>>
      %93 = tpu.memref_squeeze %92 : memref<1x!tpu.dma_semaphore, #tpu.memory_space<semaphore_mem>> -> memref<!tpu.dma_semaphore, #tpu.memory_space<semaphore_mem>>
      tpu.enqueue_dma source(%89 : memref<1x256xf32, #tpu.memory_space<any>>) target(%91 : memref<1x256xf32, #tpu.memory_space<vmem>>) target_semaphore(%93 : memref<!tpu.dma_semaphore, #tpu.memory_space<semaphore_mem>>)
      %c3_i32 = arith.constant 3 : i32
      %94 = arith.addi %69, %c3_i32 : i32
      %95 = arith.index_cast %94 : i32 to index
      %96 = memref.load %arg2[%95] : memref<32xi32, #tpu.memory_space<smem>>
      %c0_i32_43 = arith.constant 0 : i32
      %c0_i32_44 = arith.constant 0 : i32
      %c0_i32_45 = arith.constant 0 : i32
      %97 = tpu.memref_slice %arg4[%96, %c0_i32_45] : memref<32x256xf32, #tpu.memory_space<any>> -> memref<1x256xf32, #tpu.memory_space<any>>
      %c0_i32_46 = arith.constant 0 : i32
      %98 = tpu.memref_slice %arg8[%c0_i32_43, %c3_i32, %c0_i32_46] : memref<2x8x256xf32, #tpu.memory_space<vmem>> -> memref<1x1x256xf32, #tpu.memory_space<vmem>>
      %99 = tpu.memref_squeeze %98 : memref<1x1x256xf32, #tpu.memory_space<vmem>> -> memref<1x256xf32, #tpu.memory_space<vmem>>
      %100 = tpu.memref_slice %arg9[%c0_i32_44] : memref<2x!tpu.dma_semaphore, #tpu.memory_space<semaphore_mem>> -> memref<1x!tpu.dma_semaphore, #tpu.memory_space<semaphore_mem>>
      %101 = tpu.memref_squeeze %100 : memref<1x!tpu.dma_semaphore, #tpu.memory_space<semaphore_mem>> -> memref<!tpu.dma_semaphore, #tpu.memory_space<semaphore_mem>>
      tpu.enqueue_dma source(%97 : memref<1x256xf32, #tpu.memory_space<any>>) target(%99 : memref<1x256xf32, #tpu.memory_space<vmem>>) target_semaphore(%101 : memref<!tpu.dma_semaphore, #tpu.memory_space<semaphore_mem>>)
      %c4_i32 = arith.constant 4 : i32
      %102 = arith.addi %69, %c4_i32 : i32
      %103 = arith.index_cast %102 : i32 to index
      %104 = memref.load %arg2[%103] : memref<32xi32, #tpu.memory_space<smem>>
      %c0_i32_47 = arith.constant 0 : i32
      %c0_i32_48 = arith.constant 0 : i32
      %c0_i32_49 = arith.constant 0 : i32
      %105 = tpu.memref_slice %arg4[%104, %c0_i32_49] : memref<32x256xf32, #tpu.memory_space<any>> -> memref<1x256xf32, #tpu.memory_space<any>>
      %c0_i32_50 = arith.constant 0 : i32
      %106 = tpu.memref_slice %arg8[%c0_i32_47, %c4_i32, %c0_i32_50] : memref<2x8x256xf32, #tpu.memory_space<vmem>> -> memref<1x1x256xf32, #tpu.memory_space<vmem>>
      %107 = tpu.memref_squeeze %106 : memref<1x1x256xf32, #tpu.memory_space<vmem>> -> memref<1x256xf32, #tpu.memory_space<vmem>>
      %108 = tpu.memref_slice %arg9[%c0_i32_48] : memref<2x!tpu.dma_semaphore, #tpu.memory_space<semaphore_mem>> -> memref<1x!tpu.dma_semaphore, #tpu.memory_space<semaphore_mem>>
      %109 = tpu.memref_squeeze %108 : memref<1x!tpu.dma_semaphore, #tpu.memory_space<semaphore_mem>> -> memref<!tpu.dma_semaphore, #tpu.memory_space<semaphore_mem>>
      tpu.enqueue_dma source(%105 : memref<1x256xf32, #tpu.memory_space<any>>) target(%107 : memref<1x256xf32, #tpu.memory_space<vmem>>) target_semaphore(%109 : memref<!tpu.dma_semaphore, #tpu.memory_space<semaphore_mem>>)
      %c5_i32 = arith.constant 5 : i32
      %110 = arith.addi %69, %c5_i32 : i32
      %111 = arith.index_cast %110 : i32 to index
      %112 = memref.load %arg2[%111] : memref<32xi32, #tpu.memory_space<smem>>
      %c0_i32_51 = arith.constant 0 : i32
      %c0_i32_52 = arith.constant 0 : i32
      %c0_i32_53 = arith.constant 0 : i32
      %113 = tpu.memref_slice %arg4[%112, %c0_i32_53] : memref<32x256xf32, #tpu.memory_space<any>> -> memref<1x256xf32, #tpu.memory_space<any>>
      %c0_i32_54 = arith.constant 0 : i32
      %114 = tpu.memref_slice %arg8[%c0_i32_51, %c5_i32, %c0_i32_54] : memref<2x8x256xf32, #tpu.memory_space<vmem>> -> memref<1x1x256xf32, #tpu.memory_space<vmem>>
      %115 = tpu.memref_squeeze %114 : memref<1x1x256xf32, #tpu.memory_space<vmem>> -> memref<1x256xf32, #tpu.memory_space<vmem>>
      %116 = tpu.memref_slice %arg9[%c0_i32_52] : memref<2x!tpu.dma_semaphore, #tpu.memory_space<semaphore_mem>> -> memref<1x!tpu.dma_semaphore, #tpu.memory_space<semaphore_mem>>
      %117 = tpu.memref_squeeze %116 : memref<1x!tpu.dma_semaphore, #tpu.memory_space<semaphore_mem>> -> memref<!tpu.dma_semaphore, #tpu.memory_space<semaphore_mem>>
      tpu.enqueue_dma source(%113 : memref<1x256xf32, #tpu.memory_space<any>>) target(%115 : memref<1x256xf32, #tpu.memory_space<vmem>>) target_semaphore(%117 : memref<!tpu.dma_semaphore, #tpu.memory_space<semaphore_mem>>)
      %c6_i32 = arith.constant 6 : i32
      %118 = arith.addi %69, %c6_i32 : i32
      %119 = arith.index_cast %118 : i32 to index
      %120 = memref.load %arg2[%119] : memref<32xi32, #tpu.memory_space<smem>>
      %c0_i32_55 = arith.constant 0 : i32
      %c0_i32_56 = arith.constant 0 : i32
      %c0_i32_57 = arith.constant 0 : i32
      %121 = tpu.memref_slice %arg4[%120, %c0_i32_57] : memref<32x256xf32, #tpu.memory_space<any>> -> memref<1x256xf32, #tpu.memory_space<any>>
      %c0_i32_58 = arith.constant 0 : i32
      %122 = tpu.memref_slice %arg8[%c0_i32_55, %c6_i32, %c0_i32_58] : memref<2x8x256xf32, #tpu.memory_space<vmem>> -> memref<1x1x256xf32, #tpu.memory_space<vmem>>
      %123 = tpu.memref_squeeze %122 : memref<1x1x256xf32, #tpu.memory_space<vmem>> -> memref<1x256xf32, #tpu.memory_space<vmem>>
      %124 = tpu.memref_slice %arg9[%c0_i32_56] : memref<2x!tpu.dma_semaphore, #tpu.memory_space<semaphore_mem>> -> memref<1x!tpu.dma_semaphore, #tpu.memory_space<semaphore_mem>>
      %125 = tpu.memref_squeeze %124 : memref<1x!tpu.dma_semaphore, #tpu.memory_space<semaphore_mem>> -> memref<!tpu.dma_semaphore, #tpu.memory_space<semaphore_mem>>
      tpu.enqueue_dma source(%121 : memref<1x256xf32, #tpu.memory_space<any>>) target(%123 : memref<1x256xf32, #tpu.memory_space<vmem>>) target_semaphore(%125 : memref<!tpu.dma_semaphore, #tpu.memory_space<semaphore_mem>>)
      %c7_i32 = arith.constant 7 : i32
      %126 = arith.addi %69, %c7_i32 : i32
      %127 = arith.index_cast %126 : i32 to index
      %128 = memref.load %arg2[%127] : memref<32xi32, #tpu.memory_space<smem>>
      %c0_i32_59 = arith.constant 0 : i32
      %c0_i32_60 = arith.constant 0 : i32
      %c0_i32_61 = arith.constant 0 : i32
      %129 = tpu.memref_slice %arg4[%128, %c0_i32_61] : memref<32x256xf32, #tpu.memory_space<any>> -> memref<1x256xf32, #tpu.memory_space<any>>
      %c0_i32_62 = arith.constant 0 : i32
      %130 = tpu.memref_slice %arg8[%c0_i32_59, %c7_i32, %c0_i32_62] : memref<2x8x256xf32, #tpu.memory_space<vmem>> -> memref<1x1x256xf32, #tpu.memory_space<vmem>>
      %131 = tpu.memref_squeeze %130 : memref<1x1x256xf32, #tpu.memory_space<vmem>> -> memref<1x256xf32, #tpu.memory_space<vmem>>
      %132 = tpu.memref_slice %arg9[%c0_i32_60] : memref<2x!tpu.dma_semaphore, #tpu.memory_space<semaphore_mem>> -> memref<1x!tpu.dma_semaphore, #tpu.memory_space<semaphore_mem>>
      %133 = tpu.memref_squeeze %132 : memref<1x!tpu.dma_semaphore, #tpu.memory_space<semaphore_mem>> -> memref<!tpu.dma_semaphore, #tpu.memory_space<semaphore_mem>>
      tpu.enqueue_dma source(%129 : memref<1x256xf32, #tpu.memory_space<any>>) target(%131 : memref<1x256xf32, #tpu.memory_space<vmem>>) target_semaphore(%133 : memref<!tpu.dma_semaphore, #tpu.memory_space<semaphore_mem>>)
      %c8_i32_63 = arith.constant 8 : i32
    } else {
    }
    %c1_i32_5 = arith.constant 1 : i32
    %13 = arith.addi %arg1, %c1_i32_5 : i32
    %c2_i32_6 = arith.constant 2 : i32
    %14 = arith.cmpi slt, %13, %c2_i32_6 : i32
    %15 = arith.extui %14 : i1 to i32
    %c0_i32_7 = arith.constant 0 : i32
    %16 = arith.cmpi ne, %15, %c0_i32_7 : i32
    scf.if %16 {
      %c2_i32_27 = arith.constant 2 : i32
      %68 = arith.muli %arg0, %c2_i32_27 : i32
      %69 = arith.addi %68, %arg1 : i32
      %c1_i32_28 = arith.constant 1 : i32
      %70 = arith.addi %69, %c1_i32_28 : i32
      %c1_i32_29 = arith.constant 1 : i32
      %71 = arith.subi %c1_i32_29, %9 : i32
      %c8_i32 = arith.constant 8 : i32
      %72 = arith.muli %70, %c8_i32 : i32
      %c0_i32_30 = arith.constant 0 : i32
      %73 = arith.addi %72, %c0_i32_30 : i32
      %74 = arith.index_cast %73 : i32 to index
      %75 = memref.load %arg2[%74] : memref<32xi32, #tpu.memory_space<smem>>
      %c0_i32_31 = arith.constant 0 : i32
      %76 = tpu.memref_slice %arg4[%75, %c0_i32_31] : memref<32x256xf32, #tpu.memory_space<any>> -> memref<1x256xf32, #tpu.memory_space<any>>
      %c0_i32_32 = arith.constant 0 : i32
      %77 = tpu.memref_slice %arg8[%71, %c0_i32_30, %c0_i32_32] : memref<2x8x256xf32, #tpu.memory_space<vmem>> -> memref<1x1x256xf32, #tpu.memory_space<vmem>>
      %78 = tpu.memref_squeeze %77 : memref<1x1x256xf32, #tpu.memory_space<vmem>> -> memref<1x256xf32, #tpu.memory_space<vmem>>
      %79 = tpu.memref_slice %arg9[%71] : memref<2x!tpu.dma_semaphore, #tpu.memory_space<semaphore_mem>> -> memref<1x!tpu.dma_semaphore, #tpu.memory_space<semaphore_mem>>
      %80 = tpu.memref_squeeze %79 : memref<1x!tpu.dma_semaphore, #tpu.memory_space<semaphore_mem>> -> memref<!tpu.dma_semaphore, #tpu.memory_space<semaphore_mem>>
      tpu.enqueue_dma source(%76 : memref<1x256xf32, #tpu.memory_space<any>>) target(%78 : memref<1x256xf32, #tpu.memory_space<vmem>>) target_semaphore(%80 : memref<!tpu.dma_semaphore, #tpu.memory_space<semaphore_mem>>)
      %c1_i32_33 = arith.constant 1 : i32
      %81 = arith.addi %72, %c1_i32_33 : i32
      %82 = arith.index_cast %81 : i32 to index
      %83 = memref.load %arg2[%82] : memref<32xi32, #tpu.memory_space<smem>>
      %c0_i32_34 = arith.constant 0 : i32
      %84 = tpu.memref_slice %arg4[%83, %c0_i32_34] : memref<32x256xf32, #tpu.memory_space<any>> -> memref<1x256xf32, #tpu.memory_space<any>>
      %c0_i32_35 = arith.constant 0 : i32
      %85 = tpu.memref_slice %arg8[%71, %c1_i32_33, %c0_i32_35] : memref<2x8x256xf32, #tpu.memory_space<vmem>> -> memref<1x1x256xf32, #tpu.memory_space<vmem>>
      %86 = tpu.memref_squeeze %85 : memref<1x1x256xf32, #tpu.memory_space<vmem>> -> memref<1x256xf32, #tpu.memory_space<vmem>>
      %87 = tpu.memref_slice %arg9[%71] : memref<2x!tpu.dma_semaphore, #tpu.memory_space<semaphore_mem>> -> memref<1x!tpu.dma_semaphore, #tpu.memory_space<semaphore_mem>>
      %88 = tpu.memref_squeeze %87 : memref<1x!tpu.dma_semaphore, #tpu.memory_space<semaphore_mem>> -> memref<!tpu.dma_semaphore, #tpu.memory_space<semaphore_mem>>
      tpu.enqueue_dma source(%84 : memref<1x256xf32, #tpu.memory_space<any>>) target(%86 : memref<1x256xf32, #tpu.memory_space<vmem>>) target_semaphore(%88 : memref<!tpu.dma_semaphore, #tpu.memory_space<semaphore_mem>>)
      %c2_i32_36 = arith.constant 2 : i32
      %89 = arith.addi %72, %c2_i32_36 : i32
      %90 = arith.index_cast %89 : i32 to index
      %91 = memref.load %arg2[%90] : memref<32xi32, #tpu.memory_space<smem>>
      %c0_i32_37 = arith.constant 0 : i32
      %92 = tpu.memref_slice %arg4[%91, %c0_i32_37] : memref<32x256xf32, #tpu.memory_space<any>> -> memref<1x256xf32, #tpu.memory_space<any>>
      %c0_i32_38 = arith.constant 0 : i32
      %93 = tpu.memref_slice %arg8[%71, %c2_i32_36, %c0_i32_38] : memref<2x8x256xf32, #tpu.memory_space<vmem>> -> memref<1x1x256xf32, #tpu.memory_space<vmem>>
      %94 = tpu.memref_squeeze %93 : memref<1x1x256xf32, #tpu.memory_space<vmem>> -> memref<1x256xf32, #tpu.memory_space<vmem>>
      %95 = tpu.memref_slice %arg9[%71] : memref<2x!tpu.dma_semaphore, #tpu.memory_space<semaphore_mem>> -> memref<1x!tpu.dma_semaphore, #tpu.memory_space<semaphore_mem>>
      %96 = tpu.memref_squeeze %95 : memref<1x!tpu.dma_semaphore, #tpu.memory_space<semaphore_mem>> -> memref<!tpu.dma_semaphore, #tpu.memory_space<semaphore_mem>>
      tpu.enqueue_dma source(%92 : memref<1x256xf32, #tpu.memory_space<any>>) target(%94 : memref<1x256xf32, #tpu.memory_space<vmem>>) target_semaphore(%96 : memref<!tpu.dma_semaphore, #tpu.memory_space<semaphore_mem>>)
      %c3_i32 = arith.constant 3 : i32
      %97 = arith.addi %72, %c3_i32 : i32
      %98 = arith.index_cast %97 : i32 to index
      %99 = memref.load %arg2[%98] : memref<32xi32, #tpu.memory_space<smem>>
      %c0_i32_39 = arith.constant 0 : i32
      %100 = tpu.memref_slice %arg4[%99, %c0_i32_39] : memref<32x256xf32, #tpu.memory_space<any>> -> memref<1x256xf32, #tpu.memory_space<any>>
      %c0_i32_40 = arith.constant 0 : i32
      %101 = tpu.memref_slice %arg8[%71, %c3_i32, %c0_i32_40] : memref<2x8x256xf32, #tpu.memory_space<vmem>> -> memref<1x1x256xf32, #tpu.memory_space<vmem>>
      %102 = tpu.memref_squeeze %101 : memref<1x1x256xf32, #tpu.memory_space<vmem>> -> memref<1x256xf32, #tpu.memory_space<vmem>>
      %103 = tpu.memref_slice %arg9[%71] : memref<2x!tpu.dma_semaphore, #tpu.memory_space<semaphore_mem>> -> memref<1x!tpu.dma_semaphore, #tpu.memory_space<semaphore_mem>>
      %104 = tpu.memref_squeeze %103 : memref<1x!tpu.dma_semaphore, #tpu.memory_space<semaphore_mem>> -> memref<!tpu.dma_semaphore, #tpu.memory_space<semaphore_mem>>
      tpu.enqueue_dma source(%100 : memref<1x256xf32, #tpu.memory_space<any>>) target(%102 : memref<1x256xf32, #tpu.memory_space<vmem>>) target_semaphore(%104 : memref<!tpu.dma_semaphore, #tpu.memory_space<semaphore_mem>>)
      %c4_i32 = arith.constant 4 : i32
      %105 = arith.addi %72, %c4_i32 : i32
      %106 = arith.index_cast %105 : i32 to index
      %107 = memref.load %arg2[%106] : memref<32xi32, #tpu.memory_space<smem>>
      %c0_i32_41 = arith.constant 0 : i32
      %108 = tpu.memref_slice %arg4[%107, %c0_i32_41] : memref<32x256xf32, #tpu.memory_space<any>> -> memref<1x256xf32, #tpu.memory_space<any>>
      %c0_i32_42 = arith.constant 0 : i32
      %109 = tpu.memref_slice %arg8[%71, %c4_i32, %c0_i32_42] : memref<2x8x256xf32, #tpu.memory_space<vmem>> -> memref<1x1x256xf32, #tpu.memory_space<vmem>>
      %110 = tpu.memref_squeeze %109 : memref<1x1x256xf32, #tpu.memory_space<vmem>> -> memref<1x256xf32, #tpu.memory_space<vmem>>
      %111 = tpu.memref_slice %arg9[%71] : memref<2x!tpu.dma_semaphore, #tpu.memory_space<semaphore_mem>> -> memref<1x!tpu.dma_semaphore, #tpu.memory_space<semaphore_mem>>
      %112 = tpu.memref_squeeze %111 : memref<1x!tpu.dma_semaphore, #tpu.memory_space<semaphore_mem>> -> memref<!tpu.dma_semaphore, #tpu.memory_space<semaphore_mem>>
      tpu.enqueue_dma source(%108 : memref<1x256xf32, #tpu.memory_space<any>>) target(%110 : memref<1x256xf32, #tpu.memory_space<vmem>>) target_semaphore(%112 : memref<!tpu.dma_semaphore, #tpu.memory_space<semaphore_mem>>)
      %c5_i32 = arith.constant 5 : i32
      %113 = arith.addi %72, %c5_i32 : i32
      %114 = arith.index_cast %113 : i32 to index
      %115 = memref.load %arg2[%114] : memref<32xi32, #tpu.memory_space<smem>>
      %c0_i32_43 = arith.constant 0 : i32
      %116 = tpu.memref_slice %arg4[%115, %c0_i32_43] : memref<32x256xf32, #tpu.memory_space<any>> -> memref<1x256xf32, #tpu.memory_space<any>>
      %c0_i32_44 = arith.constant 0 : i32
      %117 = tpu.memref_slice %arg8[%71, %c5_i32, %c0_i32_44] : memref<2x8x256xf32, #tpu.memory_space<vmem>> -> memref<1x1x256xf32, #tpu.memory_space<vmem>>
      %118 = tpu.memref_squeeze %117 : memref<1x1x256xf32, #tpu.memory_space<vmem>> -> memref<1x256xf32, #tpu.memory_space<vmem>>
      %119 = tpu.memref_slice %arg9[%71] : memref<2x!tpu.dma_semaphore, #tpu.memory_space<semaphore_mem>> -> memref<1x!tpu.dma_semaphore, #tpu.memory_space<semaphore_mem>>
      %120 = tpu.memref_squeeze %119 : memref<1x!tpu.dma_semaphore, #tpu.memory_space<semaphore_mem>> -> memref<!tpu.dma_semaphore, #tpu.memory_space<semaphore_mem>>
      tpu.enqueue_dma source(%116 : memref<1x256xf32, #tpu.memory_space<any>>) target(%118 : memref<1x256xf32, #tpu.memory_space<vmem>>) target_semaphore(%120 : memref<!tpu.dma_semaphore, #tpu.memory_space<semaphore_mem>>)
      %c6_i32 = arith.constant 6 : i32
      %121 = arith.addi %72, %c6_i32 : i32
      %122 = arith.index_cast %121 : i32 to index
      %123 = memref.load %arg2[%122] : memref<32xi32, #tpu.memory_space<smem>>
      %c0_i32_45 = arith.constant 0 : i32
      %124 = tpu.memref_slice %arg4[%123, %c0_i32_45] : memref<32x256xf32, #tpu.memory_space<any>> -> memref<1x256xf32, #tpu.memory_space<any>>
      %c0_i32_46 = arith.constant 0 : i32
      %125 = tpu.memref_slice %arg8[%71, %c6_i32, %c0_i32_46] : memref<2x8x256xf32, #tpu.memory_space<vmem>> -> memref<1x1x256xf32, #tpu.memory_space<vmem>>
      %126 = tpu.memref_squeeze %125 : memref<1x1x256xf32, #tpu.memory_space<vmem>> -> memref<1x256xf32, #tpu.memory_space<vmem>>
      %127 = tpu.memref_slice %arg9[%71] : memref<2x!tpu.dma_semaphore, #tpu.memory_space<semaphore_mem>> -> memref<1x!tpu.dma_semaphore, #tpu.memory_space<semaphore_mem>>
      %128 = tpu.memref_squeeze %127 : memref<1x!tpu.dma_semaphore, #tpu.memory_space<semaphore_mem>> -> memref<!tpu.dma_semaphore, #tpu.memory_space<semaphore_mem>>
      tpu.enqueue_dma source(%124 : memref<1x256xf32, #tpu.memory_space<any>>) target(%126 : memref<1x256xf32, #tpu.memory_space<vmem>>) target_semaphore(%128 : memref<!tpu.dma_semaphore, #tpu.memory_space<semaphore_mem>>)
      %c7_i32 = arith.constant 7 : i32
      %129 = arith.addi %72, %c7_i32 : i32
      %130 = arith.index_cast %129 : i32 to index
      %131 = memref.load %arg2[%130] : memref<32xi32, #tpu.memory_space<smem>>
      %c0_i32_47 = arith.constant 0 : i32
      %132 = tpu.memref_slice %arg4[%131, %c0_i32_47] : memref<32x256xf32, #tpu.memory_space<any>> -> memref<1x256xf32, #tpu.memory_space<any>>
      %c0_i32_48 = arith.constant 0 : i32
      %133 = tpu.memref_slice %arg8[%71, %c7_i32, %c0_i32_48] : memref<2x8x256xf32, #tpu.memory_space<vmem>> -> memref<1x1x256xf32, #tpu.memory_space<vmem>>
      %134 = tpu.memref_squeeze %133 : memref<1x1x256xf32, #tpu.memory_space<vmem>> -> memref<1x256xf32, #tpu.memory_space<vmem>>
      %135 = tpu.memref_slice %arg9[%71] : memref<2x!tpu.dma_semaphore, #tpu.memory_space<semaphore_mem>> -> memref<1x!tpu.dma_semaphore, #tpu.memory_space<semaphore_mem>>
      %136 = tpu.memref_squeeze %135 : memref<1x!tpu.dma_semaphore, #tpu.memory_space<semaphore_mem>> -> memref<!tpu.dma_semaphore, #tpu.memory_space<semaphore_mem>>
      tpu.enqueue_dma source(%132 : memref<1x256xf32, #tpu.memory_space<any>>) target(%134 : memref<1x256xf32, #tpu.memory_space<vmem>>) target_semaphore(%136 : memref<!tpu.dma_semaphore, #tpu.memory_space<semaphore_mem>>)
      %c8_i32_49 = arith.constant 8 : i32
    } else {
    }
    %c0_i32_8 = arith.constant 0 : i32
    %c0_i32_9 = arith.constant 0 : i32
    %17 = tpu.memref_slice %arg8[%9, %c0_i32_8, %c0_i32_9] : memref<2x8x256xf32, #tpu.memory_space<vmem>> -> memref<1x8x256xf32, #tpu.memory_space<vmem>>
    %18 = tpu.memref_squeeze %17 : memref<1x8x256xf32, #tpu.memory_space<vmem>> -> memref<8x256xf32, #tpu.memory_space<vmem>>
    %c0_i32_10 = arith.constant 0 : i32
    %c0_i32_11 = arith.constant 0 : i32
    %19 = tpu.memref_slice %arg8[%9, %c0_i32_10, %c0_i32_11] : memref<2x8x256xf32, #tpu.memory_space<vmem>> -> memref<1x8x256xf32, #tpu.memory_space<vmem>>
    %20 = tpu.memref_squeeze %19 : memref<1x8x256xf32, #tpu.memory_space<vmem>> -> memref<8x256xf32, #tpu.memory_space<vmem>>
    %21 = tpu.memref_slice %arg9[%9] : memref<2x!tpu.dma_semaphore, #tpu.memory_space<semaphore_mem>> -> memref<1x!tpu.dma_semaphore, #tpu.memory_space<semaphore_mem>>
    %22 = tpu.memref_squeeze %21 : memref<1x!tpu.dma_semaphore, #tpu.memory_space<semaphore_mem>> -> memref<!tpu.dma_semaphore, #tpu.memory_space<semaphore_mem>>
    tpu.wait_dma2 semaphore(%22 : memref<!tpu.dma_semaphore, #tpu.memory_space<semaphore_mem>>) src(%18 : memref<8x256xf32, #tpu.memory_space<vmem>>) dst(%20 : memref<8x256xf32, #tpu.memory_space<vmem>>)
    %23 = arith.index_cast %9 : i32 to index
    %c0 = arith.constant 0 : index
    %c0_12 = arith.constant 0 : index
    %24 = vector.load %arg8[%23, %c0, %c0_12] : memref<2x8x256xf32, #tpu.memory_space<vmem>>, vector<1x8x256xf32>
    %25 = vector.shape_cast %24 : vector<1x8x256xf32> to vector<8x256xf32>
    %26 = vector.extract_strided_slice %25 {offsets = [0, 0], sizes = [8, 128], strides = [1, 1]} : vector<8x256xf32> to vector<8x128xf32>
    %27 = vector.extract_strided_slice %25 {offsets = [0, 128], sizes = [8, 128], strides = [1, 1]} : vector<8x256xf32> to vector<8x128xf32>
    %28 = arith.addf %26, %27 : vector<8x128xf32>
    %c0_13 = arith.constant 0 : index
    %c0_14 = arith.constant 0 : index
    %29 = vector.load %arg6[%c0_13, %c0_14] : memref<8x1xi32, #tpu.memory_space<vmem>>, vector<8x1xi32>
    %c0_15 = arith.constant 0 : index
    %c0_16 = arith.constant 0 : index
    %30 = vector.load %arg5[%c0_15, %c0_16] : memref<3x128xf32, #tpu.memory_space<vmem>>, vector<3x128xf32>
    %c0_i32_17 = arith.constant 0 : i32
    %31 = vector.broadcast %c0_i32_17 : i32 to vector<8x1xi32>
    %32 = arith.cmpi eq, %29, %31 : vector<8x1xi32>
    %cst = arith.constant 1.000000e+00 : f32
    %cst_18 = arith.constant 0.000000e+00 : f32
    %33 = vector.broadcast %cst : f32 to vector<8x1xf32>
    %34 = vector.broadcast %cst_18 : f32 to vector<8x1xf32>
    %35 = arith.select %32, %33, %34 : vector<8x1xi1>, vector<8x1xf32>
    %36 = vector.extract_strided_slice %30 {offsets = [0, 0], sizes = [1, 128], strides = [1, 1]} : vector<3x128xf32> to vector<1x128xf32>
    %37 = vector.shape_cast %36 : vector<1x128xf32> to vector<128xf32>
    %38 = vector.shape_cast %37 : vector<128xf32> to vector<1x128xf32>
    %39 = vector.broadcast %35 : vector<8x1xf32> to vector<8x128xf32>
    %40 = vector.broadcast %38 : vector<1x128xf32> to vector<8x128xf32>
    %41 = arith.mulf %39, %40 : vector<8x128xf32>
    %42 = arith.addf %28, %41 : vector<8x128xf32>
    %c1_i32_19 = arith.constant 1 : i32
    %43 = vector.broadcast %c1_i32_19 : i32 to vector<8x1xi32>
    %44 = arith.cmpi eq, %29, %43 : vector<8x1xi32>
    %cst_20 = arith.constant 1.000000e+00 : f32
    %cst_21 = arith.constant 0.000000e+00 : f32
    %45 = vector.broadcast %cst_20 : f32 to vector<8x1xf32>
    %46 = vector.broadcast %cst_21 : f32 to vector<8x1xf32>
    %47 = arith.select %44, %45, %46 : vector<8x1xi1>, vector<8x1xf32>
    %48 = vector.extract_strided_slice %30 {offsets = [1, 0], sizes = [1, 128], strides = [1, 1]} : vector<3x128xf32> to vector<1x128xf32>
    %49 = vector.shape_cast %48 : vector<1x128xf32> to vector<128xf32>
    %50 = vector.shape_cast %49 : vector<128xf32> to vector<1x128xf32>
    %51 = vector.broadcast %47 : vector<8x1xf32> to vector<8x128xf32>
    %52 = vector.broadcast %50 : vector<1x128xf32> to vector<8x128xf32>
    %53 = arith.mulf %51, %52 : vector<8x128xf32>
    %54 = arith.addf %42, %53 : vector<8x128xf32>
    %c2_i32_22 = arith.constant 2 : i32
    %55 = vector.broadcast %c2_i32_22 : i32 to vector<8x1xi32>
    %56 = arith.cmpi eq, %29, %55 : vector<8x1xi32>
    %cst_23 = arith.constant 1.000000e+00 : f32
    %cst_24 = arith.constant 0.000000e+00 : f32
    %57 = vector.broadcast %cst_23 : f32 to vector<8x1xf32>
    %58 = vector.broadcast %cst_24 : f32 to vector<8x1xf32>
    %59 = arith.select %56, %57, %58 : vector<8x1xi1>, vector<8x1xf32>
    %60 = vector.extract_strided_slice %30 {offsets = [2, 0], sizes = [1, 128], strides = [1, 1]} : vector<3x128xf32> to vector<1x128xf32>
    %61 = vector.shape_cast %60 : vector<1x128xf32> to vector<128xf32>
    %62 = vector.shape_cast %61 : vector<128xf32> to vector<1x128xf32>
    %63 = vector.broadcast %59 : vector<8x1xf32> to vector<8x128xf32>
    %64 = vector.broadcast %62 : vector<1x128xf32> to vector<8x128xf32>
    %65 = arith.mulf %63, %64 : vector<8x128xf32>
    %66 = arith.addf %54, %65 : vector<8x128xf32>
    %c0_25 = arith.constant 0 : index
    %c0_26 = arith.constant 0 : index
    %67 = vector.load %arg7[%c0_25, %c0_26] : memref<8x128xf32, #tpu.memory_space<vmem>>, vector<8x128xf32>
    tpu.vector_store %arg7[%c0_25, %c0_26], %66 {strides = array<i32>} : memref<8x128xf32, #tpu.memory_space<vmem>>, vector<8x128xf32>,
    return
  }
  func.func @transform_1(%arg0: i32, %arg1: i32, %arg2: memref<32xi32, #tpu.memory_space<smem>>, %arg3: memref<1xi32, #tpu.memory_space<smem>>) -> (i32, i32) {
    %c0_i32 = arith.constant 0 : i32
    %c0_i32_0 = arith.constant 0 : i32
    %c0_i32_1 = arith.constant 0 : i32
    return %c0_i32, %c0_i32_0 : i32, i32
  }
  func.func @transform_2(%arg0: i32, %arg1: i32, %arg2: memref<32xi32, #tpu.memory_space<smem>>, %arg3: memref<1xi32, #tpu.memory_space<smem>>) -> (i32, i32) {
    %c2_i32 = arith.constant 2 : i32
    %0 = arith.muli %arg0, %c2_i32 : i32
    %1 = arith.addi %0, %arg1 : i32
    %c0_i32 = arith.constant 0 : i32
    %c0_i32_0 = arith.constant 0 : i32
    return %1, %c0_i32 : i32, i32
  }
  func.func @transform_3(%arg0: i32, %arg1: i32, %arg2: memref<32xi32, #tpu.memory_space<smem>>, %arg3: memref<1xi32, #tpu.memory_space<smem>>) -> (i32, i32) {
    %c2_i32 = arith.constant 2 : i32
    %0 = arith.muli %arg0, %c2_i32 : i32
    %1 = arith.addi %0, %arg1 : i32
    %c0_i32 = arith.constant 0 : i32
    %c0_i32_0 = arith.constant 0 : i32
    return %1, %c0_i32 : i32, i32
  }
}

</mosaic_0001>

<bundles_post_ra>
// kernel: tpu_custom_call.1
= control target key start
LH: loop header
LB: loop body
LE: loop exit
PB: predicated region body
PF: predicated region fallthrough
CT: control target
= control target key end

     0   :  { %s1452_s21 = smov [#allocation5]   ;;  %s2183_s0 = inlined_call_operand.vmem [shape: s32[32], index: 0, kind: input, shape index: {}]   ;;  %s2184_s1 = inlined_call_operand.<no memory space> [shape: s32[1], index: 1, kind: input, shape index: {}]   ;;  %s2185_s2 = inlined_call_operand.hbm [shape: f32[32,256], index: 2, kind: input, shape index: {}]   ;;  %s2186_s3 = inlined_call_operand.vmem [shape: f32[3,128], index: 3, kind: input, shape index: {}]   ;;  %s2187_s4 = inlined_call_operand.vmem [shape: s32[32,1], index: 4, kind: input, shape index: {}]   ;;  %s2188_s5 = inlined_call_operand.hbm [shape: f32[32,128], index: 5, kind: output, shape index: {}]  }
   0x1   :  { %2223 = sst [smem:[#allocation59_spill]] %s2186_s3  ;;  %s11_s20 = sshll.u32 %s2183_s0, 4  ;;  %s12_s20 = int_to_ptr.vmem [resolvable:$true] %s11_s20 }
   0x2   :  { %2224 = sst [smem:[#allocation60_spill]] %s2187_s4 }
   0x3   :  { %2225 = sst [smem:[#allocation61_spill]] %s2188_s5 }
   0x4   :  { %14 = dma.vmem_to_smem %s12_s20, 16, %s1452_s21, [#allocation4] }
   0x5   :  { %1412 = dma.done.wait [#allocation4], 16 }
   0x6   :  { %1413 = vsyncadd [#allocation4], 4294967280 }
   0x7   :  { %18 = sfence }
   0x8   :  { %19 = vsyncpa [#allocation8], 0 }
   0x9   :  { %21 = vsyncpa [#allocation8 + $0x1], 0  ;;  %s1498_s1 = smov 0   ;;  %s1500_s22 = smov 0  }
   0xa   :  { %s1502_s23 = smov 0   ;;  %s1504_s24 = smov 0  }
   0xb   :  { %s1506_s25 = smov 0   ;;  %s1508_s26 = smov 0  }
   0xc   :  { %s1510_s0 = smov 0   ;;  %s1512_s27 = smov 0  }
   0xd LB: > { %2226 = sst [smem:[#allocation44_spill]] %s1422_s1  ;;  %s694_s28 = sadd.s32 4294967295, %s1450_s27   ;;  %s1450_s27 = sphi %s1512_s27, %s27_s27   ;;  %s1446_s0 = sphi %s1510_s0, %s2298_s0   ;;  %s1442_s26 = sphi %s1508_s26, %s2297_s26   ;;  %s1438_s25 = sphi %s1506_s25, %s2296_s25   ;;  %s1434_s24 = sphi %s1504_s24, %s2295_s24   ;;  %s1430_s23 = sphi %s1502_s23, %s2294_s23   ;;  %s1426_s22 = sphi %s1500_s22, %s2293_s22   ;;  %s1422_s1 = sphi %s1498_s1, %s2292_s1  }
   0xe   : > { %2227 = sst [smem:[#allocation45_spill]] %s1426_s22  ;;  %s36_s29 = sadd.s32 1, %s1442_s26 }
   0xf   : > { %2228 = sst [smem:[#allocation46_spill]] %s1430_s23  ;;  %s39_s30 = sadd.s32 1, %s1446_s0 }
  0x10   : > { %2229 = sst [smem:[#allocation47_spill]] %s1442_s26  ;;  %p37_p0 = scmp.ge.s32.totalorder %s36_s29, 2 }
  0x11   : > { %2230 = sst [smem:[#allocation48_spill]] %s1446_s0  ;;  %s698_s6 = sshll.u32 %s1446_s0, 1 }
  0x12   : > { %2231 = sst [smem:[#allocation49_spill]] %s1450_s27  ;;  %s695_s7 = sadd.s32 4294967294, %s1450_s27  }
  0x13   : > { %s95_s8 = sadd.s32 %s1442_s26, %s698_s6  ;;  %s2300_s29 = smov (%p37_p0, %s36_s29), 0 }
  0x14   : > { %2232 = sst [smem:[#allocation50_spill]] %s2300_s29  ;;  %s2302_s30 = smov (!%p37_p0, %s39_s30), %s1446_s0 }
  0x15   : > { %p111_p1 = scmp.ne.s32.totalorder %s1430_s23, %s1426_s22  ;;  %p112_p2 = scmp.eq.s32.totalorder %s694_s28, 3 }
  0x16   : > { %p41_p3 = scmp.ge.s32.totalorder %s2302_s30, 2  ;;  %p117_p4 = scmp.ne.s32.totalorder %s1426_s22, %s1422_s1 }
  0x17   : > { %p1551_p5 = por %p112_p2, %p111_p1  ;;  %p118_p6 = scmp.eq.s32.totalorder %s695_s7, 3 }
  0x18   : > { %s2304_s30 = smov (%p41_p3, %s2302_s30), 0  ;;  %p702_p8 = scmp.ge.s32.totalorder %s1450_s27, 1 }
  0x19   : > { %s2233_s9 = scalar_select %p1551_p5, 1, 0 }
  0x1a   : > { %2235 = sst [smem:[#allocation52_spill]] %s2304_s30  ;;  %p1557_p7 = por %p118_p6, %p117_p4 }
  0x1b   : > { %2234 = sst [smem:[#allocation51_spill]] %s2233_s9  ;;  %s699_s11 = sshll.u32 %s2304_s30, 1 }
  0x1c   : > { %s2236_s10 = scalar_select %p1557_p7, 1, 0 }
  0x1d   : > { %p150_p9 = scmp.lt.s32.totalorder %s1450_s27, 5  ;;  %s97_s12 = sadd.s32 %s699_s11, %s2300_s29 }
  0x1e   : > { %2237 = sst [smem:[#allocation53_spill]] %s2236_s10  ;;  %s101_s13 = sadd.s32 1, %s1430_s23 }
  0x1f   : > { %s98_s14 = ssub.s32 %s95_s8, %s97_s12  ;;  %p151_p10 = pnand %p702_p8, %p150_p9 }
  0x20   : > { %p99_p11 = scmp.eq.s32.totalorder %s98_s14, 0 }
  0x21   : > { %154 = sbr.rel (%p151_p10) target bundleno = 621 (0x26d), region = 28 }
  0x22   : > { %s1567_s15 = scalar_select %p99_p11, %s1430_s23, %s101_s13  }
  0x24   : > { %2238 = sst [smem:[#allocation54_spill]] %s1567_s15 }
  0x26   : > { %s2189_s16 = sand.u32 1, %s1426_s22   ;;  %p806_p12 = scmp.eq.s32.totalorder %s1434_s24, 0 }
  0x27   : > { %s1572_s17 = sshll.u32 %s2189_s16, 3  ;;  %s1576_s18 = sshll.u32 %s1438_s25, 4 }
  0x28   : > { %s751_s19 = scalar_select %p806_p12, [#allocation5], [#allocation25] }
  0x29   : > { %s752_s20 = scalar_select %p806_p12, %s1576_s18, 0 }
  0x2a   : > { %s2190_s28 = smov [#allocation2]   ;;  %s214_s7 = sadd.s32 1, %s1576_s18 }
  0x2b   : > { %s200_s21 = sld [smem:[%s751_s19 + %s752_s20]]  ;;  %s1584_s6 = sshll.u32 %s2190_s28, 4 }
  0x2c   : > { %2239 = sst [smem:[#allocation55_spill]] %s1584_s6  ;;  %s2306_s7 = smov (!%p806_p12, %s214_s7), 0 }
  0x2d   : > { %s754_s8 = scalar_select %p806_p12, [#allocation5], [#allocation26] }
  0x2e   : > { %s1454_s11 = smov [#allocation2 + $0x1]   ;;  %s1455_s26 = smov [#allocation2 + $0x2]  }
  0x2f   : > { %s1592_s12 = sshll.u32 %s1454_s11, 4  ;;  %s1595_s20 = sld [smem:[%s754_s8 + %s2306_s7]] }
  0x30   : > { %2240 = sst [smem:[#allocation56_spill]] %s1592_s12  ;;  %s1601_s15 = sshll.u32 %s1455_s26, 4 }
  0x31   : > { %s201_s14 = sshrl.u32 %s200_s21, 3  ;;  %s202_s16 = sand.u32 7, %s200_s21  }
  0x32   : > { %s711_s19 = sshll.u32 %s201_s14, 4  ;;  %2241 = sst [smem:[#allocation57_spill]] %s1601_s15 }
  0x33   : > { %s204_s28 = sadd.s32 %s711_s19, %s202_s16  ;;  %s1609_s7 = scalar_lea.hbm %s2185_s2, 64 }
  0x34   : > { %s205_s29 = scalar_lea.hbm %s2185_s2, %s204_s28 }
  0x35   : > { %s206_s0 = sshll.u32 %s205_s29, 4  ;;  %s207_s0 = int_to_ptr.hbm [resolvable:$true] %s206_s0 }
  0x36   : > { %s904_s11 = sshra.s32 %s207_s0, 4  ;;  %s905_s11 = int_to_ptr.hbm [resolvable:$true] %s904_s11 }
  0x37   : > { %s906_s13 = scalar_lea.hbm %s905_s11, 2  ;;  %p911_p2 = scmp.lt.s32.totalorder %s905_s11, %s2185_s2 }
  0x38   : > { %p907_p13 = scmp.ne.s32.totalorder %s905_s11, %s906_s13  ;;  %p912_p3 = scmp.lt.s32.totalorder %s1609_s7, %s906_s13 }
  0x3a   : > { %p908_p0 = pnand %p907_p13, %p806_p12  ;;  %p913_p4 = por %p912_p3, %p911_p2 }
  0x3c   : > { %p909_p1 = pneg %p908_p0 }
  0x3e   : > { %p914_p6 = pnand %p913_p4, %p909_p1 }
  0x40   : > { %917 = shalt.err (!%p914_p6)  }
  0x41   : > { %s2200_s26 = smov 128   ;;  %s2242_s28 = sld [smem:[#allocation55_spill]] }
  0x42   : > { %s2202_s6 = smov 1   ;;  %s216_s14 = sshrl.u32 %s1595_s20, 3 }
  0x43   : > { %s217_s13 = sand.u32 7, %s1595_s20   ;;  %s712_s19 = sshll.u32 %s216_s14, 4 }
  0x44   : > { %s246_s11 = sadd.s32 3, %s1576_s18  ;;  %s219_s16 = sadd.s32 %s712_s19, %s217_s13 }
  0x45   : > { %s220_s29 = scalar_lea.hbm %s2185_s2, %s219_s16  ;;  %s1458_s15 = smov [#allocation2 + $0x3]  }
  0x46   : > { %s1628_s12 = sshll.u32 %s1458_s15, 4  ;;  %s222_s23 = sshll.u32 %s220_s29, 4  ;;  %s223_s23 = int_to_ptr.hbm [resolvable:$true] %s222_s23 }
  0x47   : > { %s2243_s8 = int_to_ptr.vmem [resolvable:$true] %s2242_s28  ;;  %2244 = sst [smem:[#allocation55_spill]] %s1628_s12 }
  0x48   : > { %753 = dma.hbm_to_vmem [thread:$0]  (%p806_p12), %s207_s0, 32, %s2243_s8, [#allocation3], %s2200_s26, %s2200_s26, %s2202_s6 }
  0x49   : > { %s262_s28 = sadd.s32 4, %s1576_s18  ;;  %s932_s0 = sshra.s32 %s223_s23, 4  ;;  %s933_s0 = int_to_ptr.hbm [resolvable:$true] %s932_s0 }
  0x4a   : > { %s934_s8 = scalar_lea.hbm %s933_s0, 2  ;;  %p939_p11 = scmp.lt.s32.totalorder %s933_s0, %s2185_s2 }
  0x4b   : > { %p935_p8 = scmp.ne.s32.totalorder %s933_s0, %s934_s8  ;;  %p940_p13 = scmp.lt.s32.totalorder %s1609_s7, %s934_s8 }
  0x4d   : > { %p936_p9 = pnand %p935_p8, %p806_p12  ;;  %p941_p0 = por %p940_p13, %p939_p11 }
  0x4f   : > { %p937_p10 = pneg %p936_p9 }
  0x51   : > { %p942_p1 = pnand %p941_p0, %p937_p10 }
  0x53   : > { %945 = shalt.err (!%p942_p1)  }
  0x54   : > { %s2245_s15 = sld [smem:[#allocation56_spill]]  ;;  %s2247_s16 = sadd.s32 2, %s1576_s18 }
  0x55   : > { %s757_s19 = scalar_select %p806_p12, [#allocation5], [#allocation27] }
  0x56   : > { %s2308_s16 = smov (!%p806_p12, %s2247_s16), 0  ;;  %s2310_s11 = smov (!%p806_p12, %s246_s11), 0 }
  0x57   : > { %s760_s21 = scalar_select %p806_p12, [#allocation5], [#allocation28] }
  0x58   : > { %s231_s30 = sld [smem:[%s757_s19 + %s2308_s16]]  ;;  %s1459_s8 = smov [#allocation2 + $0x4]  }
  0x59   : > { %s763_s29 = scalar_select %p806_p12, [#allocation5], [#allocation29] }
  0x5a   : > { %s2246_s13 = int_to_ptr.vmem [resolvable:$true] %s2245_s15  ;;  %s1657_s0 = sld [smem:[%s760_s21 + %s2310_s11]] }
  0x5b   : > { %756 = dma.hbm_to_vmem [thread:$0]  (%p806_p12), %s223_s23, 32, %s2246_s13, [#allocation3], %s2200_s26, %s2200_s26, %s2202_s6 }
  0x5c   : > { %s1659_s20 = sshll.u32 %s1459_s8, 4  ;;  %s2312_s28 = smov (!%p806_p12, %s262_s28), 0 }
  0x5d   : > { %2248 = sst [smem:[#allocation56_spill]] %s1659_s20 }
  0x5e   : > { %s232_s14 = sshrl.u32 %s231_s30, 3  ;;  %s233_s15 = sand.u32 7, %s231_s30  }
  0x5f   : > { %s713_s13 = sshll.u32 %s232_s14, 4  ;;  %s263_s19 = sld [smem:[%s763_s29 + %s2312_s28]] }
  0x60   : > { %s235_s16 = sadd.s32 %s713_s13, %s233_s15  ;;  %s248_s26 = sshrl.u32 %s1657_s0, 3 }
  0x61   : > { %s236_s21 = scalar_lea.hbm %s2185_s2, %s235_s16  ;;  %s249_s8 = sand.u32 7, %s1657_s0  }
  0x62   : > { %s238_s6 = sshll.u32 %s236_s21, 4  ;;  %s714_s10 = sshll.u32 %s248_s26, 4  ;;  %s239_s6 = int_to_ptr.hbm [resolvable:$true] %s238_s6 }
  0x63   : > { %s960_s1 = sshra.s32 %s239_s6, 4  ;;  %s961_s1 = int_to_ptr.hbm [resolvable:$true] %s960_s1 }
  0x64   : > { %s962_s20 = scalar_lea.hbm %s961_s1, 2  ;;  %p967_p6 = scmp.lt.s32.totalorder %s961_s1, %s2185_s2 }
  0x65   : > { %p963_p2 = scmp.ne.s32.totalorder %s961_s1, %s962_s20  ;;  %p968_p8 = scmp.lt.s32.totalorder %s1609_s7, %s962_s20 }
  0x67   : > { %p964_p3 = pnand %p963_p2, %p806_p12  ;;  %p969_p9 = por %p968_p8, %p967_p6 }
  0x69   : > { %p965_p4 = pneg %p964_p3 }
  0x6b   : > { %p970_p10 = pnand %p969_p9, %p965_p4 }
  0x6d   : > { %973 = shalt.err (!%p970_p10)  }
  0x6e   : > { %s2249_s12 = smov 1   ;;  %s2250_s28 = smov 128  }
  0x6f   : > { %s2251_s26 = sld [smem:[#allocation57_spill]]  ;;  %s251_s0 = sadd.s32 %s714_s10, %s249_s8 }
  0x70   : > { %s264_s15 = sshrl.u32 %s263_s19, 3  ;;  %s252_s1 = scalar_lea.hbm %s2185_s2, %s251_s0 }
  0x71   : > { %s265_s20 = sand.u32 7, %s263_s19   ;;  %s254_s11 = sshll.u32 %s252_s1, 4  ;;  %s255_s11 = int_to_ptr.hbm [resolvable:$true] %s254_s11 }
  0x72   : > { %s715_s21 = sshll.u32 %s264_s15, 4  ;;  %s988_s14 = sshra.s32 %s255_s11, 4  ;;  %s989_s14 = int_to_ptr.hbm [resolvable:$true] %s988_s14 }
  0x73   : > { %s267_s30 = sadd.s32 %s715_s21, %s265_s20  ;;  %s990_s23 = scalar_lea.hbm %s989_s14, 2 }
  0x74   : > { %p991_p11 = scmp.ne.s32.totalorder %s989_s14, %s990_s23  ;;  %p995_p1 = scmp.lt.s32.totalorder %s989_s14, %s2185_s2 }
  0x75   : > { %s2252_s29 = int_to_ptr.vmem [resolvable:$true] %s2251_s26  ;;  %p996_p2 = scmp.lt.s32.totalorder %s1609_s7, %s990_s23 }
  0x76   : > { %759 = dma.hbm_to_vmem [thread:$0]  (%p806_p12), %s239_s6, 32, %s2252_s29, [#allocation3], %s2250_s28, %s2250_s28, %s2249_s12 }
  0x77   : > { %p992_p13 = pnand %p991_p11, %p806_p12  ;;  %p997_p3 = por %p996_p2, %p995_p1 }
  0x79   : > { %p993_p0 = pneg %p992_p13 }
  0x7b   : > { %p998_p4 = pnand %p997_p3, %p993_p0 }
  0x7d   : > { %1001 = shalt.err (!%p998_p4)  }
  0x7e   : > { %s2253_s10 = sld [smem:[#allocation55_spill]]  ;;  %s268_s0 = scalar_lea.hbm %s2185_s2, %s267_s30 }
  0x7f   : > { %s1460_s15 = smov [#allocation2 + $0x5]   ;;  %s270_s13 = sshll.u32 %s268_s0, 4  ;;  %s271_s13 = int_to_ptr.hbm [resolvable:$true] %s270_s13 }
  0x80   : > { %s1702_s23 = sshll.u32 %s1460_s15, 4  ;;  %s294_s16 = sadd.s32 6, %s1576_s18 }
  0x81   : > { %2255 = sst [smem:[#allocation57_spill]] %s1702_s23  ;;  %s1016_s1 = sshra.s32 %s271_s13, 4  ;;  %s1017_s1 = int_to_ptr.hbm [resolvable:$true] %s1016_s1 }
  0x82   : > { %s1018_s20 = scalar_lea.hbm %s1017_s1, 2  ;;  %p1023_p10 = scmp.lt.s32.totalorder %s1017_s1, %s2185_s2 }
  0x83   : > { %p1019_p6 = scmp.ne.s32.totalorder %s1017_s1, %s1018_s20  ;;  %p1024_p11 = scmp.lt.s32.totalorder %s1609_s7, %s1018_s20 }
  0x84   : > { %s2254_s19 = int_to_ptr.vmem [resolvable:$true] %s2253_s10 }
  0x85   : > { %762 = dma.hbm_to_vmem [thread:$0]  (%p806_p12), %s255_s11, 32, %s2254_s19, [#allocation3], %s2250_s28, %s2250_s28, %s2249_s12 }
  0x86   : > { %p1020_p8 = pnand %p1019_p6, %p806_p12  ;;  %p1025_p13 = por %p1024_p11, %p1023_p10 }
  0x88   : > { %p1021_p9 = pneg %p1020_p8 }
  0x8a   : > { %p1026_p0 = pnand %p1025_p13, %p1021_p9 }
  0x8c   : > { %1029 = shalt.err (!%p1026_p0)  }
  0x8d   : > { %s2256_s30 = sld [smem:[#allocation56_spill]]  ;;  %s2258_s26 = sadd.s32 5, %s1576_s18 }
  0x8e   : > { %s766_s6 = scalar_select %p806_p12, [#allocation5], [#allocation30] }
  0x8f   : > { %s2314_s26 = smov (!%p806_p12, %s2258_s26), 0  ;;  %s2316_s16 = smov (!%p806_p12, %s294_s16), 0 }
  0x90   : > { %s769_s10 = scalar_select %p806_p12, [#allocation5], [#allocation31] }
  0x91   : > { %s279_s19 = sld [smem:[%s766_s6 + %s2314_s26]]  ;;  %s1461_s8 = smov [#allocation2 + $0x6]  }
  0x92   : > { %s1729_s29 = sshll.u32 %s1461_s8, 4  ;;  %s310_s0 = sadd.s32 7, %s1576_s18 }
  0x93   : > { %s2257_s14 = int_to_ptr.vmem [resolvable:$true] %s2256_s30  ;;  %2259 = sst [smem:[#allocation55_spill]] %s1729_s29 }
  0x94   : > { %765 = dma.hbm_to_vmem [thread:$0]  (%p806_p12), %s271_s13, 32, %s2257_s14, [#allocation3], %s2250_s28, %s2250_s28, %s2249_s12 }
  0x95   : > { %s1732_s15 = sld [smem:[%s769_s10 + %s2316_s16]]  ;;  %s2318_s0 = smov (!%p806_p12, %s310_s0), 0 }
  0x96   : > { %s772_s13 = scalar_select %p806_p12, [#allocation5], [#allocation32] }
  0x97   : > { %s280_s1 = sshrl.u32 %s279_s19, 3  ;;  %s281_s20 = sand.u32 7, %s279_s19  }
  0x98   : > { %s716_s11 = sshll.u32 %s280_s1, 4  ;;  %s311_s21 = sld [smem:[%s772_s13 + %s2318_s0]] }
  0x99   : > { %s283_s30 = sadd.s32 %s716_s11, %s281_s20 }
  0x9a   : > { %s284_s18 = scalar_lea.hbm %s2185_s2, %s283_s30 }
  0x9b   : > { %s296_s16 = sshrl.u32 %s1732_s15, 3  ;;  %s286_s26 = sshll.u32 %s284_s18, 4  ;;  %s287_s26 = int_to_ptr.hbm [resolvable:$true] %s286_s26 }
  0x9c   : > { %s297_s10 = sand.u32 7, %s1732_s15   ;;  %s717_s8 = sshll.u32 %s296_s16, 4 }
  0x9d   : > { %s1044_s29 = sshra.s32 %s287_s26, 4  ;;  %s1045_s29 = int_to_ptr.hbm [resolvable:$true] %s1044_s29 }
  0x9e   : > { %s1046_s23 = scalar_lea.hbm %s1045_s29, 2  ;;  %p1051_p4 = scmp.lt.s32.totalorder %s1045_s29, %s2185_s2 }
  0x9f   : > { %p1047_p1 = scmp.ne.s32.totalorder %s1045_s29, %s1046_s23  ;;  %p1052_p6 = scmp.lt.s32.totalorder %s1609_s7, %s1046_s23 }
  0xa1   : > { %p1048_p2 = pnand %p1047_p1, %p806_p12  ;;  %p1053_p8 = por %p1052_p6, %p1051_p4 }
  0xa3   : > { %p1049_p3 = pneg %p1048_p2 }
  0xa5   : > { %p1054_p9 = pnand %p1053_p8, %p1049_p3 }
  0xa7   : > { %1057 = shalt.err (!%p1054_p9)  }
  0xa8   : > { %s2260_s0 = sld [smem:[#allocation57_spill]]  ;;  %s299_s13 = sadd.s32 %s717_s8, %s297_s10 }
  0xa9   : > { %s312_s20 = sshrl.u32 %s311_s21, 3  ;;  %s300_s29 = scalar_lea.hbm %s2185_s2, %s299_s13 }
  0xaa   : > { %s313_s23 = sand.u32 7, %s311_s21   ;;  %s302_s14 = sshll.u32 %s300_s29, 4  ;;  %s303_s14 = int_to_ptr.hbm [resolvable:$true] %s302_s14 }
  0xab   : > { %s718_s6 = sshll.u32 %s312_s20, 4  ;;  %s1072_s16 = sshra.s32 %s303_s14, 4  ;;  %s1073_s16 = int_to_ptr.hbm [resolvable:$true] %s1072_s16 }
  0xac   : > { %s315_s18 = sadd.s32 %s718_s6, %s313_s23  ;;  %s1074_s19 = scalar_lea.hbm %s1073_s16, 2 }
  0xad   : > { %p1075_p10 = scmp.ne.s32.totalorder %s1073_s16, %s1074_s19  ;;  %p1079_p0 = scmp.lt.s32.totalorder %s1073_s16, %s2185_s2 }
  0xae   : > { %s2261_s15 = int_to_ptr.vmem [resolvable:$true] %s2260_s0  ;;  %p1080_p1 = scmp.lt.s32.totalorder %s1609_s7, %s1074_s19 }
  0xaf   : > { %768 = dma.hbm_to_vmem [thread:$0]  (%p806_p12), %s287_s26, 32, %s2261_s15, [#allocation3], %s2250_s28, %s2250_s28, %s2249_s12 }
  0xb0   : > { %p1076_p11 = pnand %p1075_p10, %p806_p12  ;;  %p1081_p2 = por %p1080_p1, %p1079_p0 }
  0xb2   : > { %p1077_p13 = pneg %p1076_p11 }
  0xb4   : > { %p1082_p3 = pnand %p1081_p2, %p1077_p13 }
  0xb6   : > { %1085 = shalt.err (!%p1082_p3)  }
  0xb7   : > { %s2262_s21 = sld [smem:[#allocation55_spill]]  ;;  %s316_s15 = scalar_lea.hbm %s2185_s2, %s315_s18 }
  0xb8   : > { %s1462_s13 = smov [#allocation2 + $0x7]   ;;  %s318_s11 = sshll.u32 %s316_s15, 4  ;;  %s319_s11 = int_to_ptr.hbm [resolvable:$true] %s318_s11 }
  0xb9   : > { %s320_s20 = sshll.u32 %s1462_s13, 4  ;;  %s704_s30 = sshll.u32 %s1438_s25, 1  ;;  %s321_s20 = int_to_ptr.vmem [resolvable:$true] %s320_s20 }
  0xba   : > { %s1100_s29 = sshra.s32 %s319_s11, 4  ;;  %s1101_s29 = int_to_ptr.hbm [resolvable:$true] %s1100_s29 }
  0xbb   : > { %s1102_s23 = scalar_lea.hbm %s1101_s29, 2  ;;  %p1107_p9 = scmp.lt.s32.totalorder %s1101_s29, %s2185_s2 }
  0xbc   : > { %p1103_p4 = scmp.ne.s32.totalorder %s1101_s29, %s1102_s23  ;;  %p1108_p10 = scmp.lt.s32.totalorder %s1609_s7, %s1102_s23 }
  0xbd   : > { %s2263_s10 = int_to_ptr.vmem [resolvable:$true] %s2262_s21 }
  0xbe   : > { %771 = dma.hbm_to_vmem [thread:$0]  (%p806_p12), %s303_s14, 32, %s2263_s10, [#allocation3], %s2250_s28, %s2250_s28, %s2249_s12 }
  0xbf   : > { %p1104_p6 = pnand %p1103_p4, %p806_p12  ;;  %p1109_p11 = por %p1108_p10, %p1107_p9 }
  0xc1   : > { %p1105_p8 = pneg %p1104_p6 }
  0xc3   : > { %p1110_p13 = pnand %p1109_p11, %p1105_p8 }
  0xc5   : > { %1113 = shalt.err (!%p1110_p13)  }
  0xc6   : > { %774 = dma.hbm_to_vmem [thread:$0]  (%p806_p12), %s319_s11, 32, %s321_s20, [#allocation3], %s2250_s28, %s2250_s28, %s2249_s12 }
  0xc7   : > { %s1789_s25 = sadd.s32 %s1434_s24, %s704_s30  ;;  %p183_p0 = scmp.lt.s32.totalorder %s1434_s24, 0 }
  0xc8   : > { %2264 = sst [smem:[#allocation56_spill]] %s1789_s25  ;;  %p175_p1 = scmp.lt.s32.totalorder %s1789_s25, 3 }
  0xc9   : > { %s184_s14 = ssub.s32 0, %s1434_s24  ;;  %s326_s19 = sadd.s32 1, %s1434_s24 }
  0xca   : > { %s706_s18 = smin.u32 %s1434_s24, %s184_s14  ;;  %s2265_s4 = sld [smem:[#allocation60_spill]] }
  0xcb   : > { %s176_s26 = scalar_select %p175_p1, %s1789_s25, 3 }
  0xcc   : > { %s186_s1 = sand.u32 1, %s706_s18   ;;  %p1802_p12 = scmp.lt.s32.totalorder %s326_s19, 2 }
  0xcd   : > { %s705_s21 = sshll.u32 %s176_s26, 3  ;;  %s187_s10 = ssub.s32 0, %s186_s1 }
  0xce   : > { %s2320_s10 = smov (!%p183_p0, %s187_s10), %s186_s1  ;;  %s2209_s20 = sshll.u32 %s1789_s25, 3 }
  0xcf   : > { %p708_p2 = scmp.lt.s32.totalorder %s2320_s10, 0  ;;  %s193_s24 = sadd.s32 2, %s2320_s10 }
  0xd0   : > { %s1800_s15 = scalar_lea.vmem %s2265_s4, %s705_s21  ;;  %s1809_s11 = sadd.s32 8, %s2209_s20 }
  0xd1   : > { %s2322_s24 = smov (!%p708_p2, %s193_s24), %s2320_s10  ;;  %s353_s26 = sadd.s32 1, %s1809_s11 }
  0xd2   : > { %s776_s30 = scalar_select %p1802_p12, [#allocation5], [#allocation33] }
  0xd3   : > { %s334_s29 = ssub.s32 1, %s2322_s24  ;;  %s2324_s26 = smov (!%p1802_p12, %s353_s26), 0 }
  0xd4   : > { %s777_s6 = scalar_select %p1802_p12, %s1809_s11, 0 }
  0xd5   : > { %s723_s16 = sshll.u32 %s334_s29, 4 }
  0xd6   : > { %s336_s14 = sld [smem:[%s776_s30 + %s777_s6]]  ;;  %s1820_s18 = scalar_lea.vmem [#allocation2], %s723_s16 }
  0xd7   : > { %s347_s19 = sshll.u32 %s1820_s18, 4  ;;  %s612_s1 = scalar_lea.vmem %s1820_s18, 1 [#allocation2]  ;;  %s1836_s19 = int_to_ptr.vmem [resolvable:$true] %s347_s19 }
  0xd8   : > { %s779_s21 = scalar_select %p1802_p12, [#allocation5], [#allocation34] }
  0xd9   : > { %s1831_s30 = sshll.u32 %s612_s1, 4 }
  0xda   : > { %s1829_s20 = sld [smem:[%s779_s21 + %s2324_s26]]  ;;  %s1843_s26 = scalar_lea.sflag [#allocation3], %s334_s29 }
  0xdb   : > { %2267 = sst [smem:[#allocation57_spill]] %s1831_s30 }
  0xdc   : > { %s337_s10 = sshrl.u32 %s336_s14, 3  ;;  %s338_s8 = sand.u32 7, %s336_s14  }
  0xdd   : > { %s722_s0 = sshll.u32 %s337_s10, 4  ;;  %s618_s14 = scalar_lea.vmem %s1820_s18, 2 [#allocation2] }
  0xde   : > { %s340_s23 = sadd.s32 %s722_s0, %s338_s8 }
  0xdf   : > { %s341_s4 = scalar_lea.hbm %s2185_s2, %s340_s23 }
  0xe0   : > { %s1838_s27 = sshll.u32 %s341_s4, 4  ;;  %s346_s27 = int_to_ptr.hbm [resolvable:$true] %s1838_s27 }
  0xe1   : > { %s1128_s21 = sshra.s32 %s346_s27, 4  ;;  %s1129_s21 = int_to_ptr.hbm [resolvable:$true] %s1128_s21 }
  0xe2   : > { %s1130_s1 = scalar_lea.hbm %s1129_s21, 2  ;;  %p1135_p8 = scmp.lt.s32.totalorder %s1129_s21, %s2185_s2 }
  0xe3   : > { %p1131_p3 = scmp.ne.s32.totalorder %s1129_s21, %s1130_s1  ;;  %p1136_p9 = scmp.lt.s32.totalorder %s1609_s7, %s1130_s1 }
  0xe5   : > { %p1132_p4 = pnand %p1131_p3, %p1802_p12  ;;  %p1137_p10 = por %p1136_p9, %p1135_p8 }
  0xe7   : > { %p1133_p6 = pneg %p1132_p4 }
  0xe9   : > { %p1138_p11 = pnand %p1137_p10, %p1133_p6 }
  0xeb   : > { %1141 = shalt.err (!%p1138_p11)  }
  0xec   : > { %s1142_s4 = sshra.s32 %s1836_s19, 4  ;;  %s2268_s8 = smov [#allocation2]   ;;  %s1143_s4 = int_to_ptr.vmem [resolvable:$true] %s1142_s4 }
  0xed   : > { %s1144_s29 = scalar_lea.vmem %s1143_s4, 2  ;;  %s1857_s0 = scalar_lea.vmem %s2268_s8, 32 }
  0xee   : > { %p1145_p13 = scmp.ne.s32.totalorder %s1143_s4, %s1144_s29  ;;  %p1149_p2 = scmp.lt.s32.totalorder %s1143_s4, [#allocation2] }
  0xef   : > { %p1150_p3 = scmp.lt.s32.totalorder %s1857_s0, %s1144_s29 }
  0xf0   : > { %p1146_p0 = pnand %p1145_p13, %p1802_p12 }
  0xf1   : > { %p1151_p4 = por %p1150_p3, %p1149_p2 }
  0xf2   : > { %p1147_p1 = pneg %p1146_p0 }
  0xf4   : > { %p1152_p7 = pnand %p1151_p4, %p1147_p1 }
  0xf6   : > { %1155 = shalt.err (!%p1152_p7)  }
  0xf7   : > { %778 = dma.hbm_to_vmem [thread:$0]  (%p1802_p12), %s346_s27, 32, %s1836_s19, %s1843_s26, %s2250_s28, %s2250_s28, %s2249_s12 }
  0xf8   : > { %s355_s6 = sshrl.u32 %s1829_s20, 3  ;;  %s356_s16 = sand.u32 7, %s1829_s20  }
  0xf9   : > { %s724_s21 = sshll.u32 %s355_s6, 4  ;;  %s370_s1 = sadd.s32 2, %s1809_s11 }
  0xfa   : > { %s358_s23 = sadd.s32 %s724_s21, %s356_s16  ;;  %s1874_s10 = sshll.u32 %s618_s14, 4 }
  0xfb   : > { %2269 = sst [smem:[#allocation55_spill]] %s1874_s10  ;;  %s359_s8 = scalar_lea.hbm %s2185_s2, %s358_s23 }
  0xfc   : > { %s387_s30 = sadd.s32 3, %s1809_s11  ;;  %s1880_s9 = sshll.u32 %s359_s8, 4  ;;  %s363_s9 = int_to_ptr.hbm [resolvable:$true] %s1880_s9 }
  0xfd   : > { %s624_s5 = scalar_lea.vmem %s1820_s18, 3 [#allocation2]  ;;  %s1156_s20 = sshra.s32 %s363_s9, 4  ;;  %s1157_s20 = int_to_ptr.hbm [resolvable:$true] %s1156_s20 }
  0xfe   : > { %s1884_s27 = sshll.u32 %s624_s5, 4  ;;  %s1158_s19 = scalar_lea.hbm %s1157_s20, 2 }
  0xff   : > { %2270 = sst [smem:[#allocation58_spill]] %s1884_s27  ;;  %p1159_p7 = scmp.ne.s32.totalorder %s1157_s20, %s1158_s19 }
 0x100   : > { %p1163_p9 = scmp.lt.s32.totalorder %s1157_s20, %s2185_s2  ;;  %p1164_p10 = scmp.lt.s32.totalorder %s1609_s7, %s1158_s19 }
 0x101   : > { %p1160_p6 = pnand %p1159_p7, %p1802_p12 }
 0x102   : > { %p1165_p11 = por %p1164_p10, %p1163_p9 }
 0x103   : > { %p1161_p8 = pneg %p1160_p6 }
 0x105   : > { %p1166_p13 = pnand %p1165_p11, %p1161_p8 }
 0x107   : > { %1169 = shalt.err (!%p1166_p13)  }
 0x108   : > { %s2271_s16 = sld [smem:[#allocation57_spill]] }
 0x10e   : > { %s2272_s21 = int_to_ptr.vmem [resolvable:$true] %s2271_s16 }
 0x10f   : > { %s1170_s5 = sshra.s32 %s2272_s21, 4  ;;  %s1171_s5 = int_to_ptr.vmem [resolvable:$true] %s1170_s5 }
 0x110   : > { %s1172_s23 = scalar_lea.vmem %s1171_s5, 2  ;;  %p1177_p3 = scmp.lt.s32.totalorder %s1171_s5, [#allocation2] }
 0x111   : > { %p1173_p0 = scmp.ne.s32.totalorder %s1171_s5, %s1172_s23  ;;  %p1178_p4 = scmp.lt.s32.totalorder %s1857_s0, %s1172_s23 }
 0x113   : > { %p1174_p1 = pnand %p1173_p0, %p1802_p12  ;;  %p1179_p7 = por %p1178_p4, %p1177_p3 }
 0x115   : > { %p1175_p2 = pneg %p1174_p1 }
 0x117   : > { %p1180_p6 = pnand %p1179_p7, %p1175_p2 }
 0x119   : > { %1183 = shalt.err (!%p1180_p6)  }
 0x11a   : > { %s2273_s4 = smov %s2272_s21  ;;  %s2326_s1 = smov (!%p1802_p12, %s370_s1), 0 }
 0x11b   : > { %781 = dma.hbm_to_vmem [thread:$0]  (%p1802_p12), %s363_s9, 32, %s2273_s4, %s1843_s26, %s2250_s28, %s2250_s28, %s2249_s12 }
 0x11c   : > { %s782_s29 = scalar_select %p1802_p12, [#allocation5], [#allocation35] }
 0x11d   : > { %s785_s8 = scalar_select %p1802_p12, [#allocation5], [#allocation36] }
 0x11e   : > { %s371_s20 = sld [smem:[%s782_s29 + %s2326_s1]]  ;;  %s2328_s30 = smov (!%p1802_p12, %s387_s30), 0 }
 0x11f   : > { %s404_s19 = sadd.s32 4, %s1809_s11  ;;  %s1920_s14 = sld [smem:[%s785_s8 + %s2328_s30]] }
 0x120   : > { %s630_s6 = scalar_lea.vmem %s1820_s18, 4 [#allocation2]  ;;  %s2330_s19 = smov (!%p1802_p12, %s404_s19), 0 }
 0x121   : > { %s788_s9 = scalar_select %p1802_p12, [#allocation5], [#allocation37] }
 0x122   : > { %s1929_s4 = sshll.u32 %s630_s6, 4  ;;  %s416_s4 = int_to_ptr.vmem [resolvable:$true] %s1929_s4 }
 0x123   : > { %s1927_s1 = sld [smem:[%s788_s9 + %s2330_s19]] }
 0x124   : > { %s372_s16 = sshrl.u32 %s371_s20, 3  ;;  %s373_s21 = sand.u32 7, %s371_s20  }
 0x125   : > { %s726_s5 = sshll.u32 %s372_s16, 4  ;;  %s389_s27 = sshrl.u32 %s1920_s14, 3 }
 0x126   : > { %s375_s23 = sadd.s32 %s726_s5, %s373_s21  ;;  %s390_s22 = sand.u32 7, %s1920_s14  }
 0x127   : > { %s376_s8 = scalar_lea.hbm %s2185_s2, %s375_s23  ;;  %s728_s3 = sshll.u32 %s389_s27, 4 }
 0x128   : > { %s1935_s10 = sshll.u32 %s376_s8, 4  ;;  %s380_s10 = int_to_ptr.hbm [resolvable:$true] %s1935_s10 }
 0x129   : > { %s1184_s25 = sshra.s32 %s380_s10, 4  ;;  %s1185_s25 = int_to_ptr.hbm [resolvable:$true] %s1184_s25 }
 0x12a   : > { %s1186_s20 = scalar_lea.hbm %s1185_s25, 2  ;;  %p1191_p11 = scmp.lt.s32.totalorder %s1185_s25, %s2185_s2 }
 0x12b   : > { %p1187_p8 = scmp.ne.s32.totalorder %s1185_s25, %s1186_s20  ;;  %p1192_p13 = scmp.lt.s32.totalorder %s1609_s7, %s1186_s20 }
 0x12d   : > { %p1188_p9 = pnand %p1187_p8, %p1802_p12  ;;  %p1193_p0 = por %p1192_p13, %p1191_p11 }
 0x12f   : > { %p1189_p10 = pneg %p1188_p9 }
 0x131   : > { %p1194_p1 = pnand %p1193_p0, %p1189_p10 }
 0x133   : > { %1197 = shalt.err (!%p1194_p1)  }
 0x134   : > { %s2274_s9 = sld [smem:[#allocation55_spill]] }
 0x13a   : > { %s2275_s16 = int_to_ptr.vmem [resolvable:$true] %s2274_s9 }
 0x13b   : > { %s1198_s27 = sshra.s32 %s2275_s16, 4  ;;  %s1199_s27 = int_to_ptr.vmem [resolvable:$true] %s1198_s27 }
 0x13c   : > { %s1200_s21 = scalar_lea.vmem %s1199_s27, 2  ;;  %p1205_p7 = scmp.lt.s32.totalorder %s1199_s27, [#allocation2] }
 0x13d   : > { %p1201_p2 = scmp.ne.s32.totalorder %s1199_s27, %s1200_s21  ;;  %p1206_p6 = scmp.lt.s32.totalorder %s1857_s0, %s1200_s21 }
 0x13f   : > { %p1202_p3 = pnand %p1201_p2, %p1802_p12  ;;  %p1207_p8 = por %p1206_p6, %p1205_p7 }
 0x141   : > { %p1203_p4 = pneg %p1202_p3 }
 0x143   : > { %p1208_p9 = pnand %p1207_p8, %p1203_p4 }
 0x145   : > { %1211 = shalt.err (!%p1208_p9)  }
 0x146   : > { %s2276_s25 = smov %s2275_s16  ;;  %s392_s5 = sadd.s32 %s728_s3, %s390_s22 }
 0x147   : > { %784 = dma.hbm_to_vmem [thread:$0]  (%p1802_p12), %s380_s10, 32, %s2276_s25, %s1843_s26, %s2250_s28, %s2250_s28, %s2249_s12 }
 0x148   : > { %s406_s23 = sshrl.u32 %s1927_s1, 3  ;;  %s393_s8 = scalar_lea.hbm %s2185_s2, %s392_s5 }
 0x149   : > { %s407_s20 = sand.u32 7, %s1927_s1   ;;  %s1965_s19 = sshll.u32 %s393_s8, 4  ;;  %s397_s19 = int_to_ptr.hbm [resolvable:$true] %s1965_s19 }
 0x14a   : > { %s730_s6 = sshll.u32 %s406_s23, 4  ;;  %s1212_s16 = sshra.s32 %s397_s19, 4  ;;  %s1213_s16 = int_to_ptr.hbm [resolvable:$true] %s1212_s16 }
 0x14b   : > { %s409_s9 = sadd.s32 %s730_s6, %s407_s20  ;;  %s1214_s27 = scalar_lea.hbm %s1213_s16, 2 }
 0x14c   : > { %p1215_p10 = scmp.ne.s32.totalorder %s1213_s16, %s1214_s27  ;;  %p1219_p0 = scmp.lt.s32.totalorder %s1213_s16, %s2185_s2 }
 0x14d   : > { %p1220_p1 = scmp.lt.s32.totalorder %s1609_s7, %s1214_s27 }
 0x14e   : > { %p1216_p11 = pnand %p1215_p10, %p1802_p12 }
 0x14f   : > { %p1221_p2 = por %p1220_p1, %p1219_p0 }
 0x150   : > { %p1217_p13 = pneg %p1216_p11 }
 0x152   : > { %p1222_p3 = pnand %p1221_p2, %p1217_p13 }
 0x154   : > { %1225 = shalt.err (!%p1222_p3)  }
 0x155   : > { %s2277_s10 = sld [smem:[#allocation58_spill]] }
 0x15b   : > { %s2278_s14 = int_to_ptr.vmem [resolvable:$true] %s2277_s10 }
 0x15c   : > { %s1226_s1 = sshra.s32 %s2278_s14, 4  ;;  %s1227_s1 = int_to_ptr.vmem [resolvable:$true] %s1226_s1 }
 0x15d   : > { %s1228_s21 = scalar_lea.vmem %s1227_s1, 2  ;;  %p1233_p8 = scmp.lt.s32.totalorder %s1227_s1, [#allocation2] }
 0x15e   : > { %p1229_p4 = scmp.ne.s32.totalorder %s1227_s1, %s1228_s21  ;;  %p1234_p9 = scmp.lt.s32.totalorder %s1857_s0, %s1228_s21 }
 0x160   : > { %p1230_p7 = pnand %p1229_p4, %p1802_p12  ;;  %p1235_p10 = por %p1234_p9, %p1233_p8 }
 0x162   : > { %p1231_p6 = pneg %p1230_p7 }
 0x164   : > { %p1236_p11 = pnand %p1235_p10, %p1231_p6 }
 0x166   : > { %1239 = shalt.err (!%p1236_p11)  }
 0x167   : > { %s2279_s25 = smov %s2278_s14  ;;  %s410_s29 = scalar_lea.hbm %s2185_s2, %s409_s9 }
 0x168   : > { %787 = dma.hbm_to_vmem [thread:$0]  (%p1802_p12), %s397_s19, 32, %s2279_s25, %s1843_s26, %s2250_s28, %s2250_s28, %s2249_s12 }
 0x169   : > { %s1991_s30 = sshll.u32 %s410_s29, 4  ;;  %s421_s8 = sadd.s32 5, %s1809_s11  ;;  %s414_s30 = int_to_ptr.hbm [resolvable:$true] %s1991_s30 }
 0x16a   : > { %s1240_s20 = sshra.s32 %s414_s30, 4  ;;  %s1241_s20 = int_to_ptr.hbm [resolvable:$true] %s1240_s20 }
 0x16b   : > { %s1242_s6 = scalar_lea.hbm %s1241_s20, 2  ;;  %p1247_p2 = scmp.lt.s32.totalorder %s1241_s20, %s2185_s2 }
 0x16c   : > { %p1243_p13 = scmp.ne.s32.totalorder %s1241_s20, %s1242_s6  ;;  %p1248_p3 = scmp.lt.s32.totalorder %s1609_s7, %s1242_s6 }
 0x16e   : > { %p1244_p0 = pnand %p1243_p13, %p1802_p12  ;;  %p1249_p4 = por %p1248_p3, %p1247_p2 }
 0x170   : > { %p1245_p1 = pneg %p1244_p0 }
 0x172   : > { %p1250_p7 = pnand %p1249_p4, %p1245_p1 }
 0x174   : > { %1253 = shalt.err (!%p1250_p7)  }
 0x175   : > { %s1254_s19 = sshra.s32 %s416_s4, 4  ;;  %s1255_s19 = int_to_ptr.vmem [resolvable:$true] %s1254_s19 }
 0x176   : > { %s1256_s9 = scalar_lea.vmem %s1255_s19, 2  ;;  %p1261_p10 = scmp.lt.s32.totalorder %s1255_s19, [#allocation2] }
 0x177   : > { %p1257_p6 = scmp.ne.s32.totalorder %s1255_s19, %s1256_s9  ;;  %p1262_p11 = scmp.lt.s32.totalorder %s1857_s0, %s1256_s9 }
 0x179   : > { %p1258_p8 = pnand %p1257_p6, %p1802_p12  ;;  %p1263_p13 = por %p1262_p11, %p1261_p10 }
 0x17b   : > { %p1259_p9 = pneg %p1258_p8 }
 0x17d   : > { %p1264_p0 = pnand %p1263_p13, %p1259_p9 }
 0x17f   : > { %1267 = shalt.err (!%p1264_p0)  }
 0x180   : > { %790 = dma.hbm_to_vmem [thread:$0]  (%p1802_p12), %s414_s30, 32, %s416_s4, %s1843_s26, %s2250_s28, %s2250_s28, %s2249_s12 }
 0x181   : > { %s791_s3 = scalar_select %p1802_p12, [#allocation5], [#allocation38] }
 0x182   : > { %s2332_s8 = smov (!%p1802_p12, %s421_s8), 0  ;;  %s438_s22 = sadd.s32 6, %s1809_s11 }
 0x183   : > { %s422_s10 = sld [smem:[%s791_s3 + %s2332_s8]]  ;;  %s636_s14 = scalar_lea.vmem %s1820_s18, 5 [#allocation2] }
 0x184   : > { %s794_s1 = scalar_select %p1802_p12, [#allocation5], [#allocation39] }
 0x185   : > { %s2334_s22 = smov (!%p1802_p12, %s438_s22), 0  ;;  %s2024_s21 = sshll.u32 %s636_s14, 4  ;;  %s433_s21 = int_to_ptr.vmem [resolvable:$true] %s2024_s21 }
 0x186   : > { %s2026_s25 = sld [smem:[%s794_s1 + %s2334_s22]]  ;;  %s642_s5 = scalar_lea.vmem %s1820_s18, 6 [#allocation2] }
 0x187   : > { %s797_s4 = scalar_select %p1802_p12, [#allocation5], [#allocation40] }
 0x188   : > { %s2035_s27 = sshll.u32 %s642_s5, 4  ;;  %s450_s27 = int_to_ptr.vmem [resolvable:$true] %s2035_s27 }
 0x189   : > { %s423_s23 = sshrl.u32 %s422_s10, 3  ;;  %s424_s29 = sand.u32 7, %s422_s10  }
 0x18a   : > { %s732_s30 = sshll.u32 %s423_s23, 4 }
 0x18b   : > { %s426_s8 = sadd.s32 %s732_s30, %s424_s29 }
 0x18c   : > { %s427_s16 = scalar_lea.hbm %s2185_s2, %s426_s8  ;;  %s440_s9 = sshrl.u32 %s2026_s25, 3 }
 0x18d   : > { %s2037_s19 = sshll.u32 %s427_s16, 4  ;;  %s441_s3 = sand.u32 7, %s2026_s25   ;;  %s431_s19 = int_to_ptr.hbm [resolvable:$true] %s2037_s19 }
 0x18e   : > { %s1268_s22 = sshra.s32 %s431_s19, 4  ;;  %s1269_s22 = int_to_ptr.hbm [resolvable:$true] %s1268_s22 }
 0x18f   : > { %s1270_s14 = scalar_lea.hbm %s1269_s22, 2  ;;  %p1275_p4 = scmp.lt.s32.totalorder %s1269_s22, %s2185_s2 }
 0x190   : > { %p1271_p1 = scmp.ne.s32.totalorder %s1269_s22, %s1270_s14  ;;  %p1276_p7 = scmp.lt.s32.totalorder %s1609_s7, %s1270_s14 }
 0x192   : > { %p1272_p2 = pnand %p1271_p1, %p1802_p12  ;;  %p1277_p6 = por %p1276_p7, %p1275_p4 }
 0x194   : > { %p1273_p3 = pneg %p1272_p2 }
 0x196   : > { %p1278_p8 = pnand %p1277_p6, %p1273_p3 }
 0x198   : > { %1281 = shalt.err (!%p1278_p8)  }
 0x199   : > { %s1282_s5 = sshra.s32 %s433_s21, 4  ;;  %s1283_s5 = int_to_ptr.vmem [resolvable:$true] %s1282_s5 }
 0x19a   : > { %s1284_s23 = scalar_lea.vmem %s1283_s5, 2  ;;  %p1289_p13 = scmp.lt.s32.totalorder %s1283_s5, [#allocation2] }
 0x19b   : > { %p1285_p9 = scmp.ne.s32.totalorder %s1283_s5, %s1284_s23  ;;  %p1290_p0 = scmp.lt.s32.totalorder %s1857_s0, %s1284_s23 }
 0x19d   : > { %p1286_p10 = pnand %p1285_p9, %p1802_p12  ;;  %p1291_p1 = por %p1290_p0, %p1289_p13 }
 0x19f   : > { %p1287_p11 = pneg %p1286_p10 }
 0x1a1   : > { %p1292_p2 = pnand %p1291_p1, %p1287_p11 }
 0x1a3   : > { %1295 = shalt.err (!%p1292_p2)  }
 0x1a4   : > { %793 = dma.hbm_to_vmem [thread:$0]  (%p1802_p12), %s431_s19, 32, %s433_s21, %s1843_s26, %s2250_s28, %s2250_s28, %s2249_s12 }
 0x1a5   : > { %s734_s29 = sshll.u32 %s440_s9, 4  ;;  %s455_s22 = sadd.s32 7, %s1809_s11 }
 0x1a6   : > { %s443_s30 = sadd.s32 %s734_s29, %s441_s3 }
 0x1a7   : > { %s444_s6 = scalar_lea.hbm %s2185_s2, %s443_s30 }
 0x1a8   : > { %s2067_s16 = sshll.u32 %s444_s6, 4  ;;  %s448_s16 = int_to_ptr.hbm [resolvable:$true] %s2067_s16 }
 0x1a9   : > { %s1296_s14 = sshra.s32 %s448_s16, 4  ;;  %s1297_s14 = int_to_ptr.hbm [resolvable:$true] %s1296_s14 }
 0x1aa   : > { %s1298_s10 = scalar_lea.hbm %s1297_s14, 2  ;;  %p1303_p6 = scmp.lt.s32.totalorder %s1297_s14, %s2185_s2 }
 0x1ab   : > { %p1299_p3 = scmp.ne.s32.totalorder %s1297_s14, %s1298_s10  ;;  %p1304_p8 = scmp.lt.s32.totalorder %s1609_s7, %s1298_s10 }
 0x1ad   : > { %p1300_p4 = pnand %p1299_p3, %p1802_p12  ;;  %p1305_p9 = por %p1304_p8, %p1303_p6 }
 0x1af   : > { %p1301_p7 = pneg %p1300_p4 }
 0x1b1   : > { %p1306_p10 = pnand %p1305_p9, %p1301_p7 }
 0x1b3   : > { %1309 = shalt.err (!%p1306_p10)  }
 0x1b4   : > { %s1310_s19 = sshra.s32 %s450_s27, 4  ;;  %s1311_s19 = int_to_ptr.vmem [resolvable:$true] %s1310_s19 }
 0x1b5   : > { %s1312_s9 = scalar_lea.vmem %s1311_s19, 2  ;;  %p1317_p1 = scmp.lt.s32.totalorder %s1311_s19, [#allocation2] }
 0x1b6   : > { %p1313_p11 = scmp.ne.s32.totalorder %s1311_s19, %s1312_s9  ;;  %p1318_p2 = scmp.lt.s32.totalorder %s1857_s0, %s1312_s9 }
 0x1b8   : > { %p1314_p13 = pnand %p1313_p11, %p1802_p12  ;;  %p1319_p3 = por %p1318_p2, %p1317_p1 }
 0x1ba   : > { %p1315_p0 = pneg %p1314_p13 }
 0x1bc   : > { %p1320_p4 = pnand %p1319_p3, %p1315_p0 }
 0x1be   : > { %1323 = shalt.err (!%p1320_p4)  }
 0x1bf   : > { %796 = dma.hbm_to_vmem [thread:$0]  (%p1802_p12), %s448_s16, 32, %s450_s27, %s1843_s26, %s2250_s28, %s2250_s28, %s2249_s12 }
 0x1c0   : > { %s2336_s22 = smov (!%p1802_p12, %s455_s22), 0  ;;  %s648_s1 = scalar_lea.vmem %s1820_s18, 7 [#allocation2] }
 0x1c1   : > { %s456_s3 = sld [smem:[%s797_s4 + %s2336_s22]]  ;;  %s2098_s5 = sshll.u32 %s648_s1, 4  ;;  %s467_s5 = int_to_ptr.vmem [resolvable:$true] %s2098_s5 }
 0x1c7   : > { %s457_s23 = sshrl.u32 %s456_s3, 3  ;;  %s458_s29 = sand.u32 7, %s456_s3  }
 0x1c8   : > { %s736_s30 = sshll.u32 %s457_s23, 4 }
 0x1c9   : > { %s460_s8 = sadd.s32 %s736_s30, %s458_s29 }
 0x1ca   : > { %s461_s27 = scalar_lea.hbm %s2185_s2, %s460_s8 }
 0x1cb   : > { %s2104_s11 = sshll.u32 %s461_s27, 4  ;;  %s465_s11 = int_to_ptr.hbm [resolvable:$true] %s2104_s11 }
 0x1cc   : > { %s1324_s16 = sshra.s32 %s465_s11, 4  ;;  %s1325_s16 = int_to_ptr.hbm [resolvable:$true] %s1324_s16 }
 0x1cd   : > { %s1326_s18 = scalar_lea.hbm %s1325_s16, 2  ;;  %p1331_p9 = scmp.lt.s32.totalorder %s1325_s16, %s2185_s2 }
 0x1ce   : > { %p1327_p7 = scmp.ne.s32.totalorder %s1325_s16, %s1326_s18  ;;  %p1332_p10 = scmp.lt.s32.totalorder %s1609_s7, %s1326_s18 }
 0x1d0   : > { %p1328_p6 = pnand %p1327_p7, %p1802_p12  ;;  %p1333_p11 = por %p1332_p10, %p1331_p9 }
 0x1d2   : > { %p1329_p8 = pneg %p1328_p6 }
 0x1d4   : > { %p1334_p13 = pnand %p1333_p11, %p1329_p8 }
 0x1d6   : > { %1337 = shalt.err (!%p1334_p13)  }
 0x1d7   : > { %s1338_s14 = sshra.s32 %s467_s5, 4  ;;  %s1339_s14 = int_to_ptr.vmem [resolvable:$true] %s1338_s14 }
 0x1d8   : > { %s1340_s10 = scalar_lea.vmem %s1339_s14, 2  ;;  %p1345_p3 = scmp.lt.s32.totalorder %s1339_s14, [#allocation2] }
 0x1d9   : > { %p1341_p0 = scmp.ne.s32.totalorder %s1339_s14, %s1340_s10  ;;  %p1346_p4 = scmp.lt.s32.totalorder %s1857_s0, %s1340_s10 }
 0x1db   : > { %p1342_p1 = pnand %p1341_p0, %p1802_p12  ;;  %p1347_p7 = por %p1346_p4, %p1345_p3 }
 0x1dd   : > { %p1343_p2 = pneg %p1342_p1 }
 0x1df   : > { %p1348_p6 = pnand %p1347_p7, %p1343_p2 }
 0x1e1   : > { %1351 = shalt.err (!%p1348_p6)  }
 0x1e2   : > { %799 = dma.hbm_to_vmem [thread:$0]  (%p1802_p12), %s465_s11, 32, %s467_s5, %s1843_s26, %s2250_s28, %s2250_s28, %s2249_s12 }
 0x1e3   : > { %s172_s7 = scalar_lea.vmem [#allocation7], %s1572_s17  ;;  %s2280_s21 = sshll.u32 %s2322_s24, 4 }
 0x1e4   : > { %s474_s25 = scalar_lea.vmem [#allocation2], %s2280_s21  ;;  %s475_s19 = scalar_lea.sflag [#allocation3], %s2322_s24 }
 0x1e5   : > { %1414 = dma.done.wait %s475_s19, 256 }
 0x1e6   : > { %1415 = vsyncadd %s475_s19, 4294967040  ;;  %v1463_v0 = vmov 0   ;;  %v483_v1 = vld [vmem:[%s1800_s15] sm:$0xff]  ;;  %v1464_v2 = vmov 0.0   ;;  %s2281_s13 = sld [smem:[#allocation56_spill]]  ;;  %v481_v9 = vld [vmem:[%s474_s25 + $0x8] sm:$0xff] }
 0x1e7   : > { %886 = vset.pattern.permute.xlu0 %v1463_v0  ;;  %vm485_vm0 = vcmp.eq.s32.totalorder %v483_v1, 0  ;;  %vm495_vm1 = vcmp.eq.s32.totalorder %v483_v1, 1  ;;  %vm505_vm2 = vcmp.eq.s32.totalorder %v483_v1, 2  ;;  %s2282_s24 = sld [smem:[#allocation59_spill]]  ;;  %v480_v8 = vld [vmem:[%s474_s25] sm:$0xff]  ;;  %s531_s23 = sshll.u32 %s172_s7, 4  ;;  %s532_s23 = int_to_ptr.vmem [resolvable:$true] %s531_s23 }
 0x1e8   : > { %v486_v3 = vsel %vm485_vm0, 1.0, %v1464_v2  ;;  %v496_v4 = vsel %vm495_vm1, 1.0, %v1464_v2  ;;  %v506_v6 = vsel %vm505_vm2, 1.0, %v1464_v2  ;;  %v482_v13 = vadd.f32 %v481_v9, %v480_v8  ;;  %s2283_s15 = sld [smem:[#allocation45_spill]] }
 0x1e9   : > { %v887_v5 = vpack.i.bf16 %v496_v4, %v486_v3  ;;  %s2285_s3 = sld [smem:[#allocation61_spill]] }
 0x1eb   : > { %888 = vperm.xlu0 %886, %v887_v5  }
 0x1ec   : > { %s2284_s26 = sshll.u32 %s2281_s13, 3 }
 0x1ed   : > { %v484_v7 = vld [vmem:[%s2282_s24] sm:$0x7] }
 0x1ee   : > { %v492_v10 = vperm.slane %v484_v7, 0  ;;  %v502_v14 = vperm.slane %v484_v7, 1  ;;  %v512_v18 = vperm.slane %v484_v7, 2  ;;  %s2287_s30 = sand.u32 1, %s2283_s15  }
 0x1ef   : > { %s529_s1 = scalar_lea.hbm %s2285_s3, %s2284_s26  ;;  %s517_s8 = scalar_lea.sflag [#allocation8], %s2287_s30 }
 0x1f0   : > { %s533_s29 = sshll.u32 %s529_s1, 4  ;;  %s1372_s16 = scalar_lea.hbm %s2285_s3, 32  ;;  %s534_s29 = int_to_ptr.hbm [resolvable:$true] %s533_s29 }
 0x1f1   : > { %s1366_s20 = sshra.s32 %s534_s29, 4  ;;  %s1367_s20 = int_to_ptr.hbm [resolvable:$true] %s1366_s20 }
 0x1f2   : > { %s1368_s6 = scalar_lea.hbm %s1367_s20, 8  ;;  %p1373_p10 = scmp.lt.s32.totalorder %s1367_s20, %s2285_s3 }
 0x1f3   : > { %509 = vperm.xlu0 %886, %v506_v6   ;;  %p1369_p12 = scmp.ne.s32.totalorder %s1367_s20, %s1368_s6  ;;  %p1374_p11 = scmp.lt.s32.totalorder %s1372_s16, %s1368_s6 }
 0x1f5   : > { %p1370_p8 = pnand %p1369_p12, %p1551_p5  ;;  %p1375_p13 = por %p1374_p11, %p1373_p10 }
 0x1f7   : > { %p1371_p9 = pneg %p1370_p8 }
 0x1f9   : > { %p1376_p0 = pnand %p1375_p13, %p1371_p9 }
 0x25d   : > { %v889_v11 = vpop.permute.xlu0 %888 }
 0x25e   : > { %v890_v12 = vunpack.i.l.bf16 %v889_v11  ;;  %v891_v15 = vunpack.i.h.bf16 %v889_v11 }
 0x260   : > { %v493_v16 = vmul.f32 %v890_v12, %v492_v10  ;;  %v503_v19 = vmul.f32 %v891_v15, %v502_v14 }
 0x262   : > { %v494_v17 = vadd.f32 %v493_v16, %v482_v13 }
 0x264   : > { %v504_v21 = vadd.f32 %v503_v19, %v494_v17 }
 0x265   : > { %v510_v20 = vpop.permute.xlu0 %509 }
 0x266   : > { %v513_v22 = vmul.f32 %v512_v18, %v510_v20 }
 0x268   : > { %v514_v23 = vadd.f32 %v513_v22, %v504_v21 }
 0x26a   : > { %515 = vst [vmem:[%s172_s7] sm:$0xff] %v514_v23 }
 0x26b   : > { %1379 = shalt.err (!%p1376_p0)
}
 0x26c   : > { %800 = dma.vmem_to_hbm [thread:$0]  (%p1551_p5), %s532_s23, 128, %s534_s29, %s517_s8  }
 0x26d PF: > { %s2288_s17 = sld [smem:[#allocation49_spill]] }
 0x26e   : > { %s2289_s22 = sld [smem:[#allocation44_spill]] }
 0x26f   : > { %s2290_s14 = sld [smem:[#allocation53_spill]] }
 0x273   : > { %p808_p1 = scmp.ge.s32.totalorder %s2288_s17, 2 }
 0x274   : > { %s545_s10 = sand.u32 1, %s2289_s22  }
 0x275   : > { %p2291_p2 = scmp.ne.s32.totalorder %s2290_s14, 0  ;;  %s546_s7 = scalar_lea.sflag [#allocation8], %s545_s10 }
 0x277   : > { %p803_p3 = pnand %p808_p1, %p2291_p2 }
 0x279   : > { %p804_p4 = pneg %p803_p3 }
 0x27b   : > { %1417 = dma.done.wait (%p804_p4), %s546_s7, 128  }
 0x27c   : > { %1419 = vsyncadd (%p804_p4), %s546_s7, 4294967168  ;;  %s27_s27 = sadd.s32 1, %s2288_s17   ;;  %s2292_s1 = sld [smem:[#allocation45_spill]] }
 0x27d   : > { %p24_p7 = scmp.ge.s32.totalorder %s27_s27, 6   ;;  %s2293_s22 = sld [smem:[#allocation46_spill]] }
 0x27e   : > { %s2294_s23 = sld [smem:[#allocation54_spill]] }
 0x27f   : > { %s2295_s24 = sld [smem:[#allocation47_spill]]  ;;  %26 = sbr.rel (!%p24_p7) target bundleno = 13 (0xd), region = 106 }
 0x280   : > { %s2296_s25 = sld [smem:[#allocation48_spill]] }
 0x281   : > { %s2297_s26 = sld [smem:[#allocation50_spill]] }
 0x282   : > { %s2298_s0 = sld [smem:[#allocation52_spill]] }
 0x284   :  { %552 = vsyncpa [#allocation8], 1 }
 0x285   :  { %554 = vsyncpa [#allocation8 + $0x1], 1 }
 0x286   :  { %555 = vsyncmov [#allocation3] }
 0x289   :  { %s556_s21 = vpop.sfrf %555 }
 0x28a   :  { %p745_p5 = scmp.ne.s32.totalorder %s556_s21, 0 }
 0x28c   :  { %560 = shalt.err (%p745_p5)  }
 0x28d   :  { %562 = vsyncmov [#allocation3 + $0x1] }
 0x290   :  { %s563_s19 = vpop.sfrf %562 }
 0x291   :  { %p746_p6 = scmp.ne.s32.totalorder %s563_s19, 0 }
 0x293   :  { %567 = shalt.err (%p746_p6)  }

</bundles_post_ra>
